<compile_context>
chip_gen: v7x
topology: tpu7x:2x2x1
jax: 0.10.0
libtpu: 0.0.40
codegen_flags: <defaults>
</compile_context>

<pallas_src>
import jax
import jax.numpy as jnp
import numpy as np
from jax.experimental import pallas as pl
from jax.experimental.pallas import tpu as pltpu

LEAKY_SLOPE = 0.1          # LeakyReLU slope used by YOLOv3 Conv blocks
BN_EPS = 1e-5
_VMEM_LIMIT = 48 * 1024 * 1024   # headroom below v7x's 64 MiB physical VMEM


def _leaky(y):
    return jnp.where(y > 0, y, LEAKY_SLOPE * y)


# ----------------------------------------------------------------------------
# Fused Conv3x3(stride s) + folded-BN + LeakyReLU kernel.
# ----------------------------------------------------------------------------
def _make_conv3x3_kernel(stride, H, W, Ho, Wo, Cin, Ct):
    K, pad = 3, 1

    def kernel(x_ref, w_ref, s_ref, b_ref, o_ref, xpad_ref):
        # Zero-pad the input tile inside VMEM (no HBM pad pass).
        xpad_ref[...] = jnp.zeros(xpad_ref.shape, xpad_ref.dtype)
        xpad_ref[pad:pad + H, pad:pad + W, :] = x_ref[...]

        # Gather the K*K taps (stride folded in via strided slices).
        patches = []
        for kh in range(K):
            for kw in range(K):
                if stride == 1:
                    patches.append(xpad_ref[kh:kh + Ho, kw:kw + Wo, :])
                else:
                    patches.append(
                        xpad_ref[pl.ds(kh, Ho, stride=stride),
                                 pl.ds(kw, Wo, stride=stride), :])
        col = jnp.concatenate(patches, axis=-1).reshape(Ho * Wo, K * K * Cin)

        # Single big-contraction bf16 matmul, f32 accumulation.
        y = jnp.dot(col, w_ref[...], preferred_element_type=jnp.float32)
        y = _leaky(y * s_ref[...] + b_ref[...])          # folded BN + LeakyReLU
        o_ref[...] = y.reshape(Ho, Wo, Ct).astype(o_ref.dtype)

    return kernel


def _cout_tile(cout):
    for t in (256, 128):
        if cout >= t and cout % t == 0:
            return t
    return cout


def conv3x3_pallas(x, p, stride):
    """x: (N,H,W,Cin) bf16/f32; p: {'w':(3,3,Cin,Cout), 'scale','bias':(Cout,)}."""
    w, scale, bias = p["w"], p["scale"], p["bias"]
    x = x.astype(jnp.bfloat16)
    N, H, W, Cin = x.shape
    K, pad = 3, 1
    Cout = w.shape[-1]
    Ho = (H + 2 * pad - K) // stride + 1
    Wo = (W + 2 * pad - K) // stride + 1

    wf = w.reshape(K * K * Cin, Cout).astype(jnp.bfloat16)      # (kh,kw,ci) order
    s = scale.reshape(1, Cout).astype(jnp.float32)
    b = bias.reshape(1, Cout).astype(jnp.float32)

    Ct = _cout_tile(Cout)
    nj = Cout // Ct
    kernel = _make_conv3x3_kernel(stride, H, W, Ho, Wo, Cin, Ct)

    return pl.pallas_call(
        kernel,
        out_shape=jax.ShapeDtypeStruct((N, Ho, Wo, Cout), jnp.bfloat16),
        grid=(N, nj),
        in_specs=[
            pl.BlockSpec((None, H, W, Cin), lambda n, j: (n, 0, 0, 0)),
            pl.BlockSpec((K * K * Cin, Ct), lambda n, j: (0, j)),
            pl.BlockSpec((1, Ct), lambda n, j: (0, j)),
            pl.BlockSpec((1, Ct), lambda n, j: (0, j)),
        ],
        out_specs=pl.BlockSpec((None, Ho, Wo, Ct), lambda n, j: (n, 0, 0, j)),
        scratch_shapes=[pltpu.VMEM((H + 2 * pad, W + 2 * pad, Cin), jnp.bfloat16)],
        compiler_params=pltpu.CompilerParams(
            dimension_semantics=("parallel", "parallel"),
            vmem_limit_bytes=_VMEM_LIMIT),
    )(x, wf, s, b)


# ----------------------------------------------------------------------------
# Fused Bottleneck stage kernel: depth x [1x1 conv -> 3x3 conv -> +residual].
# The 1x1 intermediate and the running activation stay in VMEM for the whole
# stage; only the stage input/output touch HBM.
# ----------------------------------------------------------------------------
def _make_stage_kernel(D, H, W, C, Cm):
    def kernel(x_ref, w1_ref, s1_ref, b1_ref, w2_ref, s2_ref, b2_ref,
               o_ref, hpad_ref):
        xc = x_ref[...].reshape(H * W, C)                      # bf16 running act
        for d in range(D):                                     # static depth, unrolled
            # 1x1 conv -> folded BN -> LeakyReLU (kept in VMEM)
            h = jnp.dot(xc, w1_ref[d], preferred_element_type=jnp.float32)
            h = _leaky(h * s1_ref[d] + b1_ref[d])
            # zero-padded intermediate for the 3x3 conv
            hpad_ref[...] = jnp.zeros(hpad_ref.shape, hpad_ref.dtype)
            hpad_ref[1:H + 1, 1:W + 1, :] = h.astype(jnp.bfloat16).reshape(H, W, Cm)
            patches = [hpad_ref[kh:kh + H, kw:kw + W, :]
                       for kh in range(3) for kw in range(3)]
            col = jnp.concatenate(patches, axis=-1).reshape(H * W, 9 * Cm)
            # 3x3 conv -> folded BN -> LeakyReLU -> residual add
            y = jnp.dot(col, w2_ref[d], preferred_element_type=jnp.float32)
            y = _leaky(y * s2_ref[d] + b2_ref[d])
            xc = (y + xc.astype(jnp.float32)).astype(jnp.bfloat16)
        o_ref[...] = xc.reshape(H, W, C)

    return kernel


def bottleneck_stage_pallas(x, blocks):
    x = x.astype(jnp.bfloat16)
    N, H, W, C = x.shape
    D = len(blocks)
    Cm = blocks[0]["cv1"]["w"].shape[-1]

    w1 = jnp.stack([blk["cv1"]["w"].reshape(C, Cm) for blk in blocks]).astype(jnp.bfloat16)
    s1 = jnp.stack([blk["cv1"]["scale"].reshape(1, Cm) for blk in blocks]).astype(jnp.float32)
    c1 = jnp.stack([blk["cv1"]["bias"].reshape(1, Cm) for blk in blocks]).astype(jnp.float32)
    w2 = jnp.stack([blk["cv2"]["w"].reshape(9 * Cm, C) for blk in blocks]).astype(jnp.bfloat16)
    s2 = jnp.stack([blk["cv2"]["scale"].reshape(1, C) for blk in blocks]).astype(jnp.float32)
    c2 = jnp.stack([blk["cv2"]["bias"].reshape(1, C) for blk in blocks]).astype(jnp.float32)

    kernel = _make_stage_kernel(D, H, W, C, Cm)
    return pl.pallas_call(
        kernel,
        out_shape=jax.ShapeDtypeStruct((N, H, W, C), jnp.bfloat16),
        grid=(N,),
        in_specs=[
            pl.BlockSpec((None, H, W, C), lambda n: (n, 0, 0, 0)),
            pl.BlockSpec((D, C, Cm), lambda n: (0, 0, 0)),
            pl.BlockSpec((D, 1, Cm), lambda n: (0, 0, 0)),
            pl.BlockSpec((D, 1, Cm), lambda n: (0, 0, 0)),
            pl.BlockSpec((D, 9 * Cm, C), lambda n: (0, 0, 0)),
            pl.BlockSpec((D, 1, C), lambda n: (0, 0, 0)),
            pl.BlockSpec((D, 1, C), lambda n: (0, 0, 0)),
        ],
        out_specs=pl.BlockSpec((None, H, W, C), lambda n: (n, 0, 0, 0)),
        scratch_shapes=[pltpu.VMEM((H + 2, W + 2, Cm), jnp.bfloat16)],
        compiler_params=pltpu.CompilerParams(
            dimension_semantics=("parallel",),
            vmem_limit_bytes=_VMEM_LIMIT),
    )(x, w1, s1, c1, w2, s2, c2)


# ----------------------------------------------------------------------------
# Pure-JAX reference (mirrors the kernel's bf16 storage / f32 accumulation).
# ----------------------------------------------------------------------------
def _conv_ref(x, w, scale, bias, stride, residual=None):
    K = w.shape[0]
    pad = K // 2
    y = jax.lax.conv_general_dilated(
        x.astype(jnp.bfloat16), w.astype(jnp.bfloat16),
        (stride, stride), [(pad, pad), (pad, pad)],
        dimension_numbers=("NHWC", "HWIO", "NHWC"),
        preferred_element_type=jnp.float32)
    y = _leaky(y * scale.reshape(1, 1, 1, -1) + bias.reshape(1, 1, 1, -1))
    if residual is not None:
        y = y + residual.astype(jnp.float32)
    return y.astype(jnp.bfloat16)


def conv3x3_ref(x, p, stride):
    return _conv_ref(x, p["w"], p["scale"], p["bias"], stride)


def bottleneck_stage_ref(x, blocks):
    x = x.astype(jnp.bfloat16)
    for blk in blocks:
        h = _conv_ref(x, blk["cv1"]["w"], blk["cv1"]["scale"], blk["cv1"]["bias"], 1)
        x = _conv_ref(h, blk["cv2"]["w"], blk["cv2"]["scale"], blk["cv2"]["bias"], 1,
                      residual=x)
    return x


# ----------------------------------------------------------------------------
# Deterministic parameter init (Conv weight + folded BatchNorm scale/bias).
# ----------------------------------------------------------------------------
def _init_conv(key, k, cin, cout):
    kw, kg, kb, km, kv = jax.random.split(key, 5)
    w = jax.random.normal(kw, (k, k, cin, cout), jnp.float32) / np.sqrt(k * k * cin)
    gamma = 1.0 + 0.1 * jax.random.normal(kg, (cout,), jnp.float32)
    beta = 0.1 * jax.random.normal(kb, (cout,), jnp.float32)
    mean = 0.1 * jax.random.normal(km, (cout,), jnp.float32)
    var = jax.random.uniform(kv, (cout,), jnp.float32, minval=0.5, maxval=1.5)
    scale = gamma / jnp.sqrt(var + BN_EPS)
    bias = beta - mean * scale
    return {"w": w, "scale": scale, "bias": bias}


def init_backbone(key, filters, depths):
    counter = [0]

    def nxt():
        k = jax.random.fold_in(key, counter[0])
        counter[0] += 1
        return k

    def bottlenecks(ch, n):
        return [{"cv1": _init_conv(nxt(), 1, ch, ch // 2),
                 "cv2": _init_conv(nxt(), 3, ch // 2, ch)} for _ in range(n)]

    p = {}
    p["b0"] = _init_conv(nxt(), 3, filters[0], filters[1])
    p["b1"] = _init_conv(nxt(), 3, filters[1], filters[2])
    p["b2"] = bottlenecks(filters[2], depths[0])
    p["b3"] = _init_conv(nxt(), 3, filters[2], filters[3])
    p["b4"] = bottlenecks(filters[3], depths[1])
    p["b5"] = _init_conv(nxt(), 3, filters[3], filters[4])
    p["b6"] = bottlenecks(filters[4], depths[3])
    p["b7"] = _init_conv(nxt(), 3, filters[4], filters[5])
    p["b8"] = bottlenecks(filters[5], depths[3])
    p["b9"] = _init_conv(nxt(), 3, filters[5], filters[6])
    p["b10"] = bottlenecks(filters[6], depths[2])
    return p


# ----------------------------------------------------------------------------
# Backbone forward (matches the PyTorch module's dataflow; returns [b6,b8,b10]).
# ----------------------------------------------------------------------------
def backbone_forward(x_nchw, params, conv_fn, stage_fn):
    x = jnp.transpose(x_nchw, (0, 2, 3, 1)).astype(jnp.bfloat16)   # NCHW -> NHWC
    b0 = conv_fn(x, params["b0"], 1)
    b1 = conv_fn(b0, params["b1"], 2)
    b2 = stage_fn(b1, params["b2"])
    b3 = conv_fn(b2, params["b3"], 2)
    b4 = stage_fn(b3, params["b4"])
    b5 = conv_fn(b4, params["b5"], 2)
    b6 = stage_fn(b5, params["b6"])
    b7 = conv_fn(b6, params["b7"], 2)
    b8 = stage_fn(b7, params["b8"])
    b9 = conv_fn(b8, params["b9"], 2)
    b10 = stage_fn(b9, params["b10"])
    # NHWC -> NCHW (f32) to match the PyTorch output convention
    return [jnp.transpose(o.astype(jnp.float32), (0, 3, 1, 2)) for o in (b6, b8, b10)]


if __name__ == "__main__":
    # Small synthetic configuration consistent with the module's __init__.
    filters = [4, 8, 16, 32, 64, 96, 128]   # filters[0..6]
    depths = [1, 2, 2, 2]                   # depths[0..3]

    key = jax.random.PRNGKey(0)
    pkey, xkey = jax.random.split(key)
    params = init_backbone(pkey, filters, depths)
    x = jax.random.normal(xkey, (2, filters[0], 16, 16), jnp.float32)   # NCHW

    outs = backbone_forward(x, params, conv3x3_pallas, bottleneck_stage_pallas)
    outs = jax.block_until_ready(outs)

    # Pure-JAX reference (same bf16/f32 precision contract).
    refs = jax.block_until_ready(
        backbone_forward(x, params, conv3x3_ref, bottleneck_stage_ref))

    expected = [(2, filters[4], 2, 2), (2, filters[5], 1, 1), (2, filters[6], 1, 1)]
    for o, r, es in zip(outs, refs, expected):
        assert o.shape == es, (o.shape, es)
        assert bool(jnp.all(jnp.isfinite(o)))
        np.testing.assert_allclose(np.asarray(o), np.asarray(r), rtol=3e-2, atol=3e-2)

    print("KERNEL_OK")
</pallas_src>

<mosaic_0001>
module attributes {stable_mosaic.version = 11 : i64} {
  func.func @kernel(%arg0: i32, %arg1: i32, %arg2: memref<1x16x16x4xbf16, #tpu.memory_space<vmem>>, %arg3: memref<36x8xbf16, #tpu.memory_space<vmem>>, %arg4: memref<1x8xf32, #tpu.memory_space<vmem>>, %arg5: memref<1x8xf32, #tpu.memory_space<vmem>>, %arg6: memref<1x16x16x8xbf16, #tpu.memory_space<vmem>>, %arg7: memref<18x18x4xbf16, #tpu.memory_space<vmem>>) attributes {dimension_semantics = [#tpu.dimension_semantics<parallel>, #tpu.dimension_semantics<parallel>], iteration_bounds = array<i64: 2, 1>, scalar_prefetch = 0 : i64, scratch_operands = 1 : i64, tpu.core_type = #tpu.core_type<tc>, window_params = [{transform_indices = @transform_0, window_bounds = array<i64: 1, 16, 16, 4>}, {transform_indices = @transform_1, window_bounds = array<i64: 36, 8>}, {transform_indices = @transform_2, window_bounds = array<i64: 1, 8>}, {transform_indices = @transform_3, window_bounds = array<i64: 1, 8>}, {transform_indices = @transform_4, window_bounds = array<i64: 1, 16, 16, 8>}]} {
    %cst = arith.constant 0.000000e+00 : bf16
    %0 = vector.broadcast %cst : bf16 to vector<18x18x4xbf16>
    %c0 = arith.constant 0 : index
    %c0_0 = arith.constant 0 : index
    %c0_1 = arith.constant 0 : index
    %1 = vector.load %arg7[%c0, %c0_0, %c0_1] : memref<18x18x4xbf16, #tpu.memory_space<vmem>>, vector<18x18x4xbf16>
    tpu.vector_store %arg7[%c0, %c0_0, %c0_1], %0 {strides = array<i32>} : memref<18x18x4xbf16, #tpu.memory_space<vmem>>, vector<18x18x4xbf16>,
    %c0_2 = arith.constant 0 : index
    %c0_3 = arith.constant 0 : index
    %c0_4 = arith.constant 0 : index
    %c0_5 = arith.constant 0 : index
    %2 = vector.load %arg2[%c0_2, %c0_3, %c0_4, %c0_5] : memref<1x16x16x4xbf16, #tpu.memory_space<vmem>>, vector<1x16x16x4xbf16>
    %3 = vector.shape_cast %2 : vector<1x16x16x4xbf16> to vector<16x16x4xbf16>
    %c1 = arith.constant 1 : index
    %c1_6 = arith.constant 1 : index
    %c0_7 = arith.constant 0 : index
    %4 = vector.load %arg7[%c1, %c1_6, %c0_7] : memref<18x18x4xbf16, #tpu.memory_space<vmem>>, vector<16x16x4xbf16>
    tpu.vector_store %arg7[%c1, %c1_6, %c0_7], %3 {strides = array<i32>} : memref<18x18x4xbf16, #tpu.memory_space<vmem>>, vector<16x16x4xbf16>,
    %c0_8 = arith.constant 0 : index
    %c0_9 = arith.constant 0 : index
    %c0_10 = arith.constant 0 : index
    %5 = vector.load %arg7[%c0_8, %c0_9, %c0_10] : memref<18x18x4xbf16, #tpu.memory_space<vmem>>, vector<16x16x4xbf16>
    %c0_11 = arith.constant 0 : index
    %c1_12 = arith.constant 1 : index
    %c0_13 = arith.constant 0 : index
    %6 = vector.load %arg7[%c0_11, %c1_12, %c0_13] : memref<18x18x4xbf16, #tpu.memory_space<vmem>>, vector<16x16x4xbf16>
    %c0_14 = arith.constant 0 : index
    %c2 = arith.constant 2 : index
    %c0_15 = arith.constant 0 : index
    %7 = vector.load %arg7[%c0_14, %c2, %c0_15] : memref<18x18x4xbf16, #tpu.memory_space<vmem>>, vector<16x16x4xbf16>
    %c1_16 = arith.constant 1 : index
    %c0_17 = arith.constant 0 : index
    %c0_18 = arith.constant 0 : index
    %8 = vector.load %arg7[%c1_16, %c0_17, %c0_18] : memref<18x18x4xbf16, #tpu.memory_space<vmem>>, vector<16x16x4xbf16>
    %c1_19 = arith.constant 1 : index
    %c1_20 = arith.constant 1 : index
    %c0_21 = arith.constant 0 : index
    %9 = vector.load %arg7[%c1_19, %c1_20, %c0_21] : memref<18x18x4xbf16, #tpu.memory_space<vmem>>, vector<16x16x4xbf16>
    %c1_22 = arith.constant 1 : index
    %c2_23 = arith.constant 2 : index
    %c0_24 = arith.constant 0 : index
    %10 = vector.load %arg7[%c1_22, %c2_23, %c0_24] : memref<18x18x4xbf16, #tpu.memory_space<vmem>>, vector<16x16x4xbf16>
    %c2_25 = arith.constant 2 : index
    %c0_26 = arith.constant 0 : index
    %c0_27 = arith.constant 0 : index
    %11 = vector.load %arg7[%c2_25, %c0_26, %c0_27] : memref<18x18x4xbf16, #tpu.memory_space<vmem>>, vector<16x16x4xbf16>
    %c2_28 = arith.constant 2 : index
    %c1_29 = arith.constant 1 : index
    %c0_30 = arith.constant 0 : index
    %12 = vector.load %arg7[%c2_28, %c1_29, %c0_30] : memref<18x18x4xbf16, #tpu.memory_space<vmem>>, vector<16x16x4xbf16>
    %c2_31 = arith.constant 2 : index
    %c2_32 = arith.constant 2 : index
    %c0_33 = arith.constant 0 : index
    %13 = vector.load %arg7[%c2_31, %c2_32, %c0_33] : memref<18x18x4xbf16, #tpu.memory_space<vmem>>, vector<16x16x4xbf16>
    %14 = tpu.concatenate %5, %6, %7, %8, %9, %10, %11, %12, %13 in 2 : vector<16x16x4xbf16>, vector<16x16x4xbf16>, vector<16x16x4xbf16>, vector<16x16x4xbf16>, vector<16x16x4xbf16>, vector<16x16x4xbf16>, vector<16x16x4xbf16>, vector<16x16x4xbf16>, vector<16x16x4xbf16> -> vector<16x16x36xbf16>
    %15 = vector.shape_cast %14 : vector<16x16x36xbf16> to vector<256x36xbf16>
    %c0_34 = arith.constant 0 : index
    %c0_35 = arith.constant 0 : index
    %16 = vector.load %arg3[%c0_34, %c0_35] : memref<36x8xbf16, #tpu.memory_space<vmem>>, vector<36x8xbf16>
    %cst_36 = arith.constant dense<0.000000e+00> : vector<256x8xf32>
    %17 = tpu.matmul %15, %16, %cst_36 {dimension_numbers = #tpu.dot_dimension_numbers<[1], [0], [0], [1], [0, 0, 1, 1], [], []>} : vector<256x36xbf16>, vector<36x8xbf16>, vector<256x8xf32> -> vector<256x8xf32>
    %c0_37 = arith.constant 0 : index
    %c0_38 = arith.constant 0 : index
    %18 = vector.load %arg4[%c0_37, %c0_38] : memref<1x8xf32, #tpu.memory_space<vmem>>, vector<1x8xf32>
    %19 = vector.broadcast %18 : vector<1x8xf32> to vector<256x8xf32>
    %20 = arith.mulf %17, %19 : vector<256x8xf32>
    %c0_39 = arith.constant 0 : index
    %c0_40 = arith.constant 0 : index
    %21 = vector.load %arg5[%c0_39, %c0_40] : memref<1x8xf32, #tpu.memory_space<vmem>>, vector<1x8xf32>
    %22 = vector.broadcast %21 : vector<1x8xf32> to vector<256x8xf32>
    %23 = arith.addf %20, %22 : vector<256x8xf32>
    %cst_41 = arith.constant 0.000000e+00 : f32
    %24 = vector.broadcast %cst_41 : f32 to vector<256x8xf32>
    %25 = arith.cmpf ogt, %23, %24 : vector<256x8xf32>
    %cst_42 = arith.constant 1.000000e-01 : f32
    %26 = vector.broadcast %cst_42 : f32 to vector<256x8xf32>
    %27 = arith.mulf %26, %23 : vector<256x8xf32>
    %28 = arith.select %25, %23, %27 : vector<256x8xi1>, vector<256x8xf32>
    %29 = vector.shape_cast %28 : vector<256x8xf32> to vector<16x16x8xf32>
    %30 = arith.truncf %29 : vector<16x16x8xf32> to vector<16x16x8xbf16>
    %c0_43 = arith.constant 0 : index
    %c0_44 = arith.constant 0 : index
    %c0_45 = arith.constant 0 : index
    %c0_46 = arith.constant 0 : index
    %31 = vector.load %arg6[%c0_43, %c0_44, %c0_45, %c0_46] : memref<1x16x16x8xbf16, #tpu.memory_space<vmem>>, vector<1x16x16x8xbf16>
    %32 = vector.shape_cast %31 : vector<1x16x16x8xbf16> to vector<16x16x8xbf16>
    %33 = vector.shape_cast %30 : vector<16x16x8xbf16> to vector<1x16x16x8xbf16>
    tpu.vector_store %arg6[%c0_43, %c0_44, %c0_45, %c0_46], %33 {strides = array<i32>} : memref<1x16x16x8xbf16, #tpu.memory_space<vmem>>, vector<1x16x16x8xbf16>,
    return
  }
  func.func @transform_0(%arg0: i32, %arg1: i32) -> (i32, i32, i32, i32) {
    %c0_i32 = arith.constant 0 : i32
    %c0_i32_0 = arith.constant 0 : i32
    %c0_i32_1 = arith.constant 0 : i32
    %c0_i32_2 = arith.constant 0 : i32
    return %arg0, %c0_i32, %c0_i32_0, %c0_i32_1 : i32, i32, i32, i32
  }
  func.func @transform_1(%arg0: i32, %arg1: i32) -> (i32, i32) {
    %c0_i32 = arith.constant 0 : i32
    %c0_i32_0 = arith.constant 0 : i32
    return %c0_i32, %arg1 : i32, i32
  }
  func.func @transform_2(%arg0: i32, %arg1: i32) -> (i32, i32) {
    %c0_i32 = arith.constant 0 : i32
    %c0_i32_0 = arith.constant 0 : i32
    return %c0_i32, %arg1 : i32, i32
  }
  func.func @transform_3(%arg0: i32, %arg1: i32) -> (i32, i32) {
    %c0_i32 = arith.constant 0 : i32
    %c0_i32_0 = arith.constant 0 : i32
    return %c0_i32, %arg1 : i32, i32
  }
  func.func @transform_4(%arg0: i32, %arg1: i32) -> (i32, i32, i32, i32) {
    %c0_i32 = arith.constant 0 : i32
    %c0_i32_0 = arith.constant 0 : i32
    %c0_i32_1 = arith.constant 0 : i32
    return %arg0, %c0_i32, %c0_i32_0, %arg1 : i32, i32, i32, i32
  }
}

</mosaic_0001>

<bundles_post_ra>
// kernel: tpu_custom_call.1
= control target key start
LH: loop header
LB: loop body
LE: loop exit
PB: predicated region body
PF: predicated region fallthrough
CT: control target
= control target key end

     0   :  { %s3969_s15 = smov 0   ;;  %s3971_s16 = smov 0   ;;  %s5445_s0 = inlined_call_operand.vmem [shape: bf16[2,16,16,4], index: 0, kind: input, shape index: {}]   ;;  %s5446_s1 = inlined_call_operand.vmem [shape: bf16[36,8], index: 1, kind: input, shape index: {}]   ;;  %s5447_s2 = inlined_call_operand.vmem [shape: f32[1,8], index: 2, kind: input, shape index: {}]   ;;  %s5448_s3 = inlined_call_operand.vmem [shape: f32[1,8], index: 3, kind: input, shape index: {}]   ;;  %s5449_s4 = inlined_call_operand.vmem [shape: bf16[2,16,16,8], index: 4, kind: output, shape index: {}]  }
   0x1   :  { %s3973_s17 = smov 0  }
   0x2 LB: > { %s26_s18 = sadd.s32 1, %s3929_s16  ;;  %p3433_p0 = scmp.ge.s32.totalorder %s3933_s17, 1  ;;  %s3933_s17 = sphi %s3973_s17, %s14_s17   ;;  %s3929_s16 = sphi %s3971_s16, %s5474_s16   ;;  %s3925_s15 = sphi %s3969_s15, %s5473_s15  }
   0x3   : > { %p28_p1 = scmp.ge.s32.totalorder %s26_s18, 2  ;;  %p201_p2 = scmp.lt.s32.totalorder %s3933_s17, 3 }
   0x5   : > { %s5476_s18 = smov (%p28_p1, %s26_s18), 0  ;;  %p202_p3 = pnand %p3433_p0, %p201_p2 }
   0x7   : > { %205 = sbr.rel (%p202_p3) target bundleno = 657 (0x291), region = 36 }
   0xe   : > { %vm264_vm0 = vcmask 27648   ;;  %vm267_vm1 = vcmask 24576   ;;  %v3935_v0 = vmov 0   ;;  %p240_p4 = scmp.lt.s32.totalorder %s3925_s15, 1  ;;  %vm1387_vm2 = vcmask 1046528   ;;  %s3936_s23 = smov 8  }
   0xf   : > { %265 = vst.msk [vmem:[#allocation2] sm:$0xf] %vm264_vm0, %v3935_v0  ;;  %266 = vst.msk [vmem:[#allocation2 + $0x4] sm:$0xf] %vm264_vm0, %v3935_v0  ;;  %vm352_vm3 = vsmask.f32 256 }
  0x10   : > { %268 = vst.msk [vmem:[#allocation2 + $0x8] sm:$0x1] %vm267_vm1, %v3935_v0  ;;  %271 = vst.msk [vmem:[#allocation2 + $0x14] sm:$0x1] %vm267_vm1, %v3935_v0  ;;  %s5478_s15 = smov (!%p240_p4, %s3925_s15), 1  ;;  %s3937_s24 = smov 4  }
  0x11   : > { %269 = vst.msk [vmem:[#allocation2 + $0xc] sm:$0xf] %vm264_vm0, %v3935_v0  ;;  %270 = vst.msk [vmem:[#allocation2 + $0x10] sm:$0xf] %vm264_vm0, %v3935_v0  ;;  %s3637_s19 = sshll.u32 %s5478_s15, 7  ;;  %s3938_s25 = smov 12  }
  0x12   : > { %272 = vst.msk [vmem:[#allocation2 + $0x18] sm:$0xf] %vm264_vm0, %v3935_v0  ;;  %273 = vst.msk [vmem:[#allocation2 + $0x1c] sm:$0xf] %vm264_vm0, %v3935_v0  ;;  %s4053_s22 = scalar_lea.vmem %s5445_s0, %s3637_s19  ;;  %vm353_vm4 = vsmask.f32 4368 }
  0x13   : > { %274 = vst.msk [vmem:[#allocation2 + $0x20] sm:$0x1] %vm267_vm1, %v3935_v0  ;;  %277 = vst.msk [vmem:[#allocation2 + $0x2c] sm:$0x1] %vm267_vm1, %v3935_v0  ;;  %vm677_vm5 = vsmask.f32 7938 }
  0x14   : > { %275 = vst.msk [vmem:[#allocation2 + $0x24] sm:$0xf] %vm264_vm0, %v3935_v0  ;;  %276 = vst.msk [vmem:[#allocation2 + $0x28] sm:$0xf] %vm264_vm0, %v3935_v0  ;;  %vm1114_vm6 = vsmask.f32 7424 }
  0x15   : > { %278 = vst.msk [vmem:[#allocation2 + $0x30] sm:$0xf] %vm264_vm0, %v3935_v0  ;;  %279 = vst.msk [vmem:[#allocation2 + $0x34] sm:$0xf] %vm264_vm0, %v3935_v0  ;;  %v336_v1 = vld [vmem:[%s4053_s22 + $0x40] sm:$0xf] }
  0x16   : > { %280 = vst.msk [vmem:[#allocation2 + $0x38] sm:$0x1] %vm267_vm1, %v3935_v0  ;;  %283 = vst.msk [vmem:[#allocation2 + $0x44] sm:$0x1] %vm267_vm1, %v3935_v0  ;;  %v337_v2 = vld [vmem:[%s4053_s22 + $0x44] sm:$0xf] }
  0x17   : > { %281 = vst.msk [vmem:[#allocation2 + $0x3c] sm:$0xf] %vm264_vm0, %v3935_v0  ;;  %282 = vst.msk [vmem:[#allocation2 + $0x40] sm:$0xf] %vm264_vm0, %v3935_v0  ;;  %v320_v3 = vld [vmem:[%s4053_s22] sm:$0xf] }
  0x18   : > { %284 = vst.msk [vmem:[#allocation2 + $0x48] sm:$0xf] %vm264_vm0, %v3935_v0  ;;  %285 = vst.msk [vmem:[#allocation2 + $0x4c] sm:$0xf] %vm264_vm0, %v3935_v0  ;;  %v794_v4 = vld [vmem:[#allocation2 + $0x4] sm:$0xf] }
  0x19   : > { %286 = vst.msk [vmem:[#allocation2 + $0x50] sm:$0x1] %vm267_vm1, %v3935_v0  ;;  %289 = vst.msk [vmem:[#allocation2 + $0x5c] sm:$0x1] %vm267_vm1, %v3935_v0  ;;  %v841_v5 = vld [vmem:[#allocation2] sm:$0xe] }
  0x1a   : > { %287 = vst.msk [vmem:[#allocation2 + $0x54] sm:$0xf] %vm264_vm0, %v3935_v0  ;;  %288 = vst.msk [vmem:[#allocation2 + $0x58] sm:$0xf] %vm264_vm0, %v3935_v0  ;;  %v3470_v7 = vcombine.low %v841_v5, %v794_v4  ;;  %v793_v8 = vld [vmem:[#allocation2] sm:$0xf] }
  0x1b   : > { %290 = vst.msk [vmem:[#allocation2 + $0x60] sm:$0xf] %vm264_vm0, %v3935_v0  ;;  %291 = vst.msk [vmem:[#allocation2 + $0x64] sm:$0xf] %vm264_vm0, %v3935_v0  ;;  %v492_v9 = vshrl.u32 %v336_v1, 16  ;;  %v4058_v10 = vcombine.low %v793_v8, %v794_v4  ;;  %v495_v11 = vshll.u32 %v336_v1, 16 }
  0x1c   : > { %292 = vst.msk [vmem:[#allocation2 + $0x68] sm:$0x1] %vm267_vm1, %v3935_v0  ;;  %295 = vst.msk [vmem:[#allocation2 + $0x74] sm:$0x1] %vm267_vm1, %v3935_v0  ;;  %v500_v12 = vshrl.u32 %v337_v2, 16  ;;  %v503_v13 = vshll.u32 %v337_v2, 16 }
  0x1d   : > { %293 = vst.msk [vmem:[#allocation2 + $0x6c] sm:$0xf] %vm264_vm0, %v3935_v0  ;;  %294 = vst.msk [vmem:[#allocation2 + $0x70] sm:$0xf] %vm264_vm0, %v3935_v0  ;;  %v1388_v14 = vrot.slane %v3470_v7, 1  ;;  %v494_v17 = vrot.slane %v492_v9, 7 }
  0x1e   : > { %296 = vst.msk [vmem:[#allocation2 + $0x78] sm:$0xf] %vm264_vm0, %v3935_v0  ;;  %297 = vst.msk [vmem:[#allocation2 + $0x7c] sm:$0xf] %vm264_vm0, %v3935_v0  ;;  %v1116_v19 = vshrl.u32 %v4058_v10, 16  ;;  %v1118_v20 = vshll.u32 %v4058_v10, 16 }
  0x1f   : > { %298 = vst.msk [vmem:[#allocation2 + $0x80] sm:$0x1] %vm267_vm1, %v3935_v0  ;;  %301 = vst.msk [vmem:[#allocation2 + $0x8c] sm:$0x1] %vm267_vm1, %v3935_v0  ;;  %v4062_v21 = vrot.slane %v500_v12, 7  ;;  %v356_v24 = vshrl.u32 %v320_v3, 16  ;;  %v497_v28 = vor.u32 %v495_v11, %v494_v17 }
  0x20   : > { %299 = vst.msk [vmem:[#allocation2 + $0x84] sm:$0xf] %vm264_vm0, %v3935_v0  ;;  %300 = vst.msk [vmem:[#allocation2 + $0x88] sm:$0xf] %vm264_vm0, %v3935_v0  ;;  %v321_v23 = vld [vmem:[%s4053_s22 + $0x4] sm:$0xf] }
  0x21   : > { %302 = vst.msk [vmem:[#allocation2 + $0x90] sm:$0xf] %vm264_vm0, %v3935_v0  ;;  %303 = vst.msk [vmem:[#allocation2 + $0x94] sm:$0xf] %vm264_vm0, %v3935_v0  ;;  %v498_v29 = vrot.slane %v494_v17, 4  ;;  %v1120_v32 = vrot.slane %v1118_v20, 1  ;;  %v505_v33 = vor.u32 %v503_v13, %v4062_v21 }
  0x22   : > { %304 = vst.msk [vmem:[#allocation2 + $0x98] sm:$0x1] %vm267_vm1, %v3935_v0  ;;  %307 = vst.msk [vmem:[#allocation2 + $0xa4] sm:$0x1] %vm267_vm1, %v3935_v0  ;;  %v679_v30 = vld [vmem:[#allocation2 + $0xc] sm:$0xf] }
  0x23   : > { %305 = vst.msk [vmem:[#allocation2 + $0x9c] sm:$0xf] %vm264_vm0, %v3935_v0  ;;  %306 = vst.msk [vmem:[#allocation2 + $0xa0] sm:$0xf] %vm264_vm0, %v3935_v0  ;;  %v338_v31 = vld [vmem:[%s4053_s22 + $0x48] sm:$0xf]  ;;  %v1121_v42 = vor.u32 %v1120_v32, %v1116_v19 }
  0x24   : > { %308 = vst.msk [vmem:[#allocation2 + $0xa8] sm:$0xf] %vm264_vm0, %v3935_v0  ;;  %309 = vst.msk [vmem:[#allocation2 + $0xac] sm:$0xf] %vm264_vm0, %v3935_v0  ;;  %v737_v18 = vld [vmem:[#allocation2 + $0x6c] sm:$0xf] }
  0x25   : > { %310 = vst.msk [vmem:[#allocation2 + $0xb0] sm:$0x1] %vm267_vm1, %v3935_v0  ;;  %313 = vst.msk [vmem:[#allocation2 + $0xbc] sm:$0x1] %vm267_vm1, %v3935_v0  ;;  %v358_v34 = vrot.slane %v356_v24, 7  ;;  %v359_v35 = vshll.u32 %v320_v3, 16 }
  0x26   : > { %311 = vst.msk [vmem:[#allocation2 + $0xb4] sm:$0xf] %vm264_vm0, %v3935_v0  ;;  %312 = vst.msk [vmem:[#allocation2 + $0xb8] sm:$0xf] %vm264_vm0, %v3935_v0  ;;  %v339_v36 = vld [vmem:[%s4053_s22 + $0x4c] sm:$0xf] }
  0x27   : > { %314 = vst.msk [vmem:[#allocation2 + $0xc0] sm:$0xf] %vm264_vm0, %v3935_v0  ;;  %315 = vst.msk [vmem:[#allocation2 + $0xc4] sm:$0xf] %vm264_vm0, %v3935_v0  ;;  %v364_v38 = vshrl.u32 %v321_v23, 16  ;;  %v367_v39 = vshll.u32 %v321_v23, 16  ;;  %v361_v44 = vor.u32 %v359_v35, %v358_v34 }
  0x28   : > { %316 = vst.msk [vmem:[#allocation2 + $0xc8] sm:$0x1] %vm267_vm1, %v3935_v0  ;;  %319 = vst.msk [vmem:[#allocation2 + $0xd4] sm:$0x1] %vm267_vm1, %v3935_v0  ;;  %v509_v40 = vshrl.u32 %v338_v31, 16  ;;  %v362_v45 = vrot.slane %v358_v34, 4 }
  0x29   : > { %317 = vst.msk [vmem:[#allocation2 + $0xcc] sm:$0xf] %vm264_vm0, %v3935_v0  ;;  %318 = vst.msk [vmem:[#allocation2 + $0xd0] sm:$0xf] %vm264_vm0, %v3935_v0  ;;  %v322_v41 = vld [vmem:[%s4053_s22 + $0x8] sm:$0xf] }
  0x2a   : > { %v3769_v6 = vld [vmem:[#allocation2 + $0x8] ss:$0 sps:$4 sm:$0x11]   ;;  %vm4066_vm7 = vmand %vm264_vm0, %vm677_vm5  ;;  %v366_v46 = vrot.slane %v364_v38, 7  ;;  %v511_v47 = vrot.slane %v509_v40, 7  ;;  %v512_v48 = vshll.u32 %v338_v31, 16 }
  0x2b   : > { %v1389_v15 = vrot.slane %v3769_v6, 1  ;;  %v1123_v16 = vshll.u32 %v3769_v6, 16  ;;  %vm4074_vm8 = vmor %vm352_vm3, %vm353_vm4  ;;  %v738_v37 = vsel %vm4066_vm7, %v497_v28, %v737_v18  ;;  %v517_v49 = vshrl.u32 %v339_v36, 16  ;;  %v323_v50 = vld [vmem:[%s4053_s22 + $0xc] sm:$0xf]  ;;  %s3939_s26 = smov 16  }
  0x2c   : > { %v506_v43 = vsel %vm4074_vm8, %v498_v29, %v505_v33  ;;  %739 = vst [vmem:[#allocation2 + $0x6c] sm:$0xf] %v738_v37  ;;  %v680_v52 = vsel %vm4066_vm7, %v361_v44, %v679_v30  ;;  %v520_v53 = vshll.u32 %v339_v36, 16  ;;  %v744_v54 = vld [vmem:[#allocation2 + $0x78] sm:$0xf]  ;;  %v373_v55 = vshrl.u32 %v322_v41, 16  ;;  %vm4105_vm9 = vmand %vm267_vm1, %vm352_vm3 }
  0x2d   : > { %v1390_v25 = vsel %vm1387_vm2, %v1388_v14, %v1389_v15  ;;  %v1125_v26 = vrot.slane %v1123_v16, 1  ;;  %740 = vst.msk [vmem:[#allocation2 + $0x70] sm:$0xf] %vm264_vm0, %v506_v43  ;;  %v334_v56 = vld [vmem:[%s4053_s22 + $0x38] sm:$0xf]  ;;  %v369_v57 = vor.u32 %v367_v39, %v366_v46  ;;  %v514_v58 = vor.u32 %v512_v48, %v511_v47  ;;  %s3940_s27 = smov 20  }
  0x2e   : > { %1436 = vrot.lane.b32.xlu0 %v1390_v25, %s3936_s23  ;;  %681 = vst [vmem:[#allocation2 + $0xc] sm:$0xf] %v680_v52  ;;  %v515_v59 = vrot.slane %v511_v47, 4  ;;  %v4094_v60 = vrot.slane %v517_v49, 7  ;;  %v375_v61 = vrot.slane %v373_v55, 7  ;;  %v376_v62 = vshll.u32 %v322_v41, 16 }
  0x2f   : > { %v1126_v51 = vsel %vm1114_vm6, %v1121_v42, %v1125_v26  ;;  %v381_v63 = vshrl.u32 %v323_v50, 16  ;;  %v384_v0 = vshll.u32 %v323_v50, 16  ;;  %v335_v1 = vld [vmem:[%s4053_s22 + $0x3c] sm:$0xf]  ;;  %v370_v2 = vsel %vm4074_vm8, %v362_v45, %v369_v57  ;;  %v688_v5 = vld [vmem:[#allocation2 + $0x18] sm:$0xf] }
  0x30   : > { %v522_v3 = vor.u32 %v520_v53, %v4094_v60  ;;  %v745_v4 = vsel %vm4066_vm7, %v514_v58, %v744_v54  ;;  %v475_v6 = vshrl.u32 %v334_v56, 16  ;;  %682 = vst.msk [vmem:[#allocation2 + $0x10] sm:$0xf] %vm264_vm0, %v370_v2  ;;  %v378_v7 = vor.u32 %v376_v62, %v375_v61  ;;  %v685_v17 = vld [vmem:[#allocation2 + $0x14] sm:$0x1]  ;;  %s3941_s28 = smov 24  }
  0x31   : > { %746 = vst [vmem:[#allocation2 + $0x78] sm:$0xf] %v745_v4  ;;  %v379_v8 = vrot.slane %v375_v61, 4  ;;  %v383_v9 = vrot.slane %v381_v63, 7  ;;  %v478_v11 = vshll.u32 %v334_v56, 16  ;;  %v483_v16 = vshrl.u32 %v335_v1, 16 }
  0x32   : > { %1307 = vrot.lane.b32.xlu0 %v1126_v51, %s3937_s24  ;;  %v523_v14 = vsel %vm4074_vm8, %v515_v59, %v522_v3  ;;  %v477_v15 = vrot.slane %v475_v6, 7  ;;  %v689_v20 = vsel %vm4066_vm7, %v378_v7, %v688_v5  ;;  %v486_v23 = vshll.u32 %v335_v1, 16  ;;  %v730_v24 = vld [vmem:[#allocation2 + $0x60] sm:$0xf]  ;;  %v741_v30 = vld [vmem:[#allocation2 + $0x74] sm:$0x1] }
  0x33   : > { %v873_v13 = vld [vmem:[#allocation2 + $0x6c] sm:$0xf]  ;;  %747 = vst.msk [vmem:[#allocation2 + $0x7c] sm:$0xf] %vm264_vm0, %v523_v14  ;;  %v386_v19 = vor.u32 %v384_v0, %v383_v9  ;;  %v371_v25 = vrot.slane %v366_v46, 4  ;;  %v485_v32 = vrot.slane %v483_v16, 7 }
  0x34   : > { %v4111_v18 = vld [vmem:[#allocation2 + $0x70] sm:$0xf]  ;;  %690 = vst [vmem:[#allocation2 + $0x18] sm:$0xf] %v689_v20  ;;  %v480_v28 = vor.u32 %v478_v11, %v477_v15  ;;  %v481_v29 = vrot.slane %v477_v15, 4  ;;  %v507_v34 = vrot.slane %v4062_v21, 4 }
  0x35   : > { %v4117_v26 = vcombine.low %v873_v13, %v4111_v18  ;;  %v387_v31 = vsel %vm4074_vm8, %v379_v8, %v386_v19  ;;  %v686_v33 = vsel %vm4105_vm9, %v371_v25, %v685_v17  ;;  %v812_v35 = vld [vmem:[#allocation2 + $0x70] sm:$0xf]  ;;  %v850_v36 = vld [vmem:[#allocation2 + $0x6c] sm:$0xe]  ;;  %v734_v39 = vld [vmem:[#allocation2 + $0x68] sm:$0x1]  ;;  %v488_v41 = vor.u32 %v486_v23, %v485_v32 }
  0x36   : > { %v857_v37 = vld [vmem:[#allocation2 + $0xc] sm:$0xf]  ;;  %691 = vst.msk [vmem:[#allocation2 + $0x1c] sm:$0xf] %vm264_vm0, %v387_v31  ;;  %v731_v38 = vsel %vm4066_vm7, %v480_v28, %v730_v24  ;;  %687 = vst [vmem:[#allocation2 + $0x14] sm:$0x1] %v686_v33  ;;  %v742_v44 = vsel %vm4105_vm9, %v507_v34, %v741_v30  ;;  %v3479_v48 = vcombine.low %v850_v36, %v812_v35 }
  0x37   : > { %1564 = vrot.lane.b32.xlu1 %v4117_v26, %s3938_s25  ;;  %v692_v40 = vld [vmem:[#allocation2 + $0x20] sm:$0x1]  ;;  %v490_v42 = vrot.slane %v485_v32, 4  ;;  %732 = vst [vmem:[#allocation2 + $0x60] sm:$0xf] %v731_v38  ;;  %v388_v45 = vrot.slane %v383_v9, 4  ;;  %v489_v50 = vsel %vm4074_vm8, %v481_v29, %v488_v41 }
  0x38   : > { %v842_v43 = vld [vmem:[#allocation2 + $0xc] sm:$0xe]  ;;  %v4131_v46 = vld [vmem:[#allocation2 + $0x10] sm:$0xf]  ;;  %v875_v47 = vld [vmem:[#allocation2 + $0x78] sm:$0xf] }
  0x39   : > { %v795_v21 = vld [vmem:[#allocation2 + $0xc] sm:$0xf]  ;;  %743 = vst [vmem:[#allocation2 + $0x74] sm:$0x1] %v742_v44  ;;  %v4134_v49 = vcombine.low %v857_v37, %v4131_v46  ;;  %v735_v51 = vsel %vm4105_vm9, %v490_v42, %v734_v39  ;;  %v796_v52 = vld [vmem:[#allocation2 + $0x10] sm:$0xf]  ;;  %v693_v56 = vsel %vm4105_vm9, %v388_v45, %v692_v40 }
  0x3a   : > { %v4140_v53 = vld [vmem:[#allocation2 + $0x7c] sm:$0xf]  ;;  %733 = vst.msk [vmem:[#allocation2 + $0x64] sm:$0xf] %vm264_vm0, %v489_v50  ;;  %736 = vst [vmem:[#allocation2 + $0x68] sm:$0x1] %v735_v51  ;;  %v3471_v54 = vcombine.low %v842_v43, %v796_v52  ;;  %v4143_v55 = vcombine.low %v795_v21, %v796_v52 }
  0x3b   : > { %1548 = vrot.lane.b32.xlu0 %v4134_v49, %s3938_s25  ;;  %v4150_v57 = vcombine.low %v875_v47, %v4140_v53  ;;  %v859_v58 = vld [vmem:[#allocation2 + $0x18] sm:$0xf]  ;;  %v811_v59 = vld [vmem:[#allocation2 + $0x6c] sm:$0xf]  ;;  %694 = vst [vmem:[#allocation2 + $0x20] sm:$0x1] %v693_v56 }
  0x3c   : > { %v1631_v61 = vshll.u32 %v4134_v49, 16  ;;  %v1415_v62 = vrot.slane %v3479_v48, 1  ;;  %v1130_v63 = vshll.u32 %v4143_v55, 16  ;;  %v1391_v1 = vrot.slane %v3471_v54, 1  ;;  %v905_v19 = vld [vmem:[#allocation2 + $0xc] sm:$0xe] }
  0x3d   : > { %1566 = vrot.lane.b32.xlu1 %v4150_v57, %s3938_s25  ;;  %v4156_v0 = vld [vmem:[#allocation2 + $0x1c] sm:$0xf]  ;;  %v1629_v2 = vshrl.u32 %v4134_v49, 16  ;;  %v4160_v6 = vcombine.low %v811_v59, %v812_v35  ;;  %v3783_v7 = vld [vmem:[#allocation2 + $0x14] ss:$0 sps:$4 sm:$0x11]   ;;  %v3518_v47 = vcombine.low %v905_v19, %v4131_v46 }
  0x3e   : > { %v3487_v3 = vcombine.low %v859_v58, %v4156_v0  ;;  %v849_v4 = vld [vmem:[#allocation2 + $0x60] sm:$0xe]  ;;  %v1128_v8 = vshrl.u32 %v4143_v55, 16  ;;  %v1132_v13 = vrot.slane %v1130_v63, 1  ;;  %v1392_v16 = vrot.slane %v3783_v7, 1  ;;  %s3942_s7 = smov 28  }
  0x3f   : > { %v809_v5 = vld [vmem:[#allocation2 + $0x60] sm:$0xf]  ;;  %v1224_v14 = vshrl.u32 %v4160_v6, 16  ;;  %v1135_v17 = vshll.u32 %v3783_v7, 16  ;;  %v1226_v25 = vshll.u32 %v4160_v6, 16  ;;  %v1633_v31 = vrot.slane %v1631_v61, 1 }
  0x40   : > { %v1643_v9 = vshll.u32 %v3487_v3, 16  ;;  %1550 = vrot.lane.b32.xlu0 %v3487_v3, %s3938_s25  ;;  %v3787_v11 = vld [vmem:[#allocation2 + $0x74] ss:$0 sps:$4 sm:$0x11]   ;;  %v1393_v28 = vsel %vm1387_vm2, %v1391_v1, %v1392_v16  ;;  %v1641_v32 = vshrl.u32 %v3487_v3, 16  ;;  %v1133_v35 = vor.u32 %v1132_v13, %v1128_v8  ;;  %s3943_s8 = smov 32  }
  0x41   : > { %v810_v15 = vld [vmem:[#allocation2 + $0x64] sm:$0xf]  ;;  %v3780_v20 = vld [vmem:[#allocation2 + $0x68] ss:$0 sps:$4 sm:$0x11]   ;;  %v1416_v29 = vrot.slane %v3787_v11, 1  ;;  %v1634_v56 = vor.u32 %v1633_v31, %v1629_v2 }
  0x42   : > { %v3478_v23 = vcombine.low %v849_v4, %v810_v15  ;;  %v4165_v24 = vcombine.low %v809_v5, %v810_v15  ;;  %v3789_v30 = vld [vmem:[#allocation2 + $0x14] ss:$0 sps:$4 sm:$0x11]   ;;  %v1413_v34 = vrot.slane %v3780_v20, 1  ;;  %v1137_v36 = vrot.slane %v1135_v17, 1 }
  0x43   : > { %v4170_v37 = vld [vmem:[#allocation2 + $0x20] ss:$0 sps:$4 sm:$0x11]   ;;  %v1219_v40 = vshll.u32 %v3780_v20, 16  ;;  %v1636_v41 = vshll.u32 %v3789_v30, 16  ;;  %v1645_v43 = vrot.slane %v1643_v9, 1  ;;  %v1417_v50 = vsel %vm1387_vm2, %v1415_v62, %v1416_v29 }
  0x44   : > { %v1412_v33 = vrot.slane %v3478_v23, 1  ;;  %1438 = vrot.lane.b32.xlu0 %v1393_v28, %s3936_s23  ;;  %v1212_v38 = vshrl.u32 %v4165_v24, 16  ;;  %v1214_v39 = vshll.u32 %v4165_v24, 16  ;;  %v1648_v21 = vshll.u32 %v4170_v37, 16  ;;  %v906_v59 = vld [vmem:[#allocation2 + $0x18] sm:$0xe] }
  0x45   : > { %v1228_v44 = vrot.slane %v1226_v25, 1  ;;  %v1727_v45 = vshll.u32 %v4117_v26, 16  ;;  %v1221_v49 = vrot.slane %v1219_v40, 1  ;;  %v1231_v51 = vshll.u32 %v3787_v11, 16  ;;  %v748_v3 = vld [vmem:[#allocation2 + $0x80] sm:$0x1] }
  0x46   : > { %v1414_v42 = vsel %vm1387_vm2, %v1412_v33, %v1413_v34  ;;  %v1216_v48 = vrot.slane %v1214_v39, 1  ;;  %v4180_v52 = vld [vmem:[#allocation2 + $0x74] ss:$0 sps:$4 sm:$0x11]   ;;  %v1638_v58 = vrot.slane %v1636_v41, 1  ;;  %v1138_v61 = vsel %vm1114_vm6, %v1133_v35, %v1137_v36 }
  0x47   : > { %1452 = vrot.lane.b32.xlu1 %v1414_v42, %s3936_s23  ;;  %v1646_v63 = vor.u32 %v1645_v43, %v1641_v32  ;;  %v1650_v1 = vrot.slane %v1648_v21, 1  ;;  %v1229_v46 = vor.u32 %v1228_v44, %v1224_v14  ;;  %v1900_v62 = vrot.slane %v3518_v47, 1  ;;  %v324_v8 = vld [vmem:[%s4053_s22 + $0x10] sm:$0xf]  ;;  %v325_v14 = vld [vmem:[%s4053_s22 + $0x14] sm:$0xf] }
  0x48   : > { %v1217_v54 = vor.u32 %v1216_v48, %v1212_v38  ;;  %v1901_v5 = vrot.slane %v3789_v30, 1  ;;  %v1725_v7 = vshrl.u32 %v4117_v26, 16  ;;  %v1233_v2 = vrot.slane %v1231_v51, 1  ;;  %v340_v20 = vld [vmem:[%s4053_s22 + $0x50] sm:$0xf] }
  0x49   : > { %v1729_v9 = vrot.slane %v1727_v45, 1  ;;  %v1732_v11 = vshll.u32 %v4180_v52, 16  ;;  %v524_v13 = vrot.slane %v4094_v60, 4  ;;  %v3519_v15 = vcombine.low %v906_v59, %v4156_v0  ;;  %v341_v29 = vld [vmem:[%s4053_s22 + $0x54] sm:$0xf] }
  0x4a   : > { %v1222_v4 = vsel %vm1114_vm6, %v1217_v54, %v1221_v49  ;;  %v1639_v16 = vsel %vm1114_vm6, %v1634_v56, %v1638_v58  ;;  %v1739_v17 = vshll.u32 %v4150_v57, 16  ;;  %v1651_v19 = vsel %vm1114_vm6, %v1646_v63, %v1650_v1  ;;  %v695_v33 = vld [vmem:[#allocation2 + $0x24] sm:$0xf]  ;;  %v922_v36 = vld [vmem:[#allocation2 + $0x18] sm:$0xf] }
  0x4b   : > { %1454 = vrot.lane.b32.xlu1 %v1417_v50, %s3936_s23  ;;  %1323 = vrot.lane.b32.xlu0 %v1222_v4, %s3937_s24  ;;  %v749_v26 = vsel %vm4105_vm9, %v524_v13, %v748_v3  ;;  %v1902_v23 = vsel %vm1387_vm2, %v1900_v62, %v1901_v5  ;;  %v390_v25 = vshrl.u32 %v324_v8, 16  ;;  %v393_v60 = vshll.u32 %v324_v8, 16  ;;  %v4205_v41 = vld [vmem:[#allocation2 + $0x1c] sm:$0xf]  ;;  %v913_v44 = vld [vmem:[#allocation2 + $0x6c] sm:$0xe] }
  0x4c   : > { %750 = vst [vmem:[#allocation2 + $0x80] sm:$0x1] %v749_v26  ;;  %v398_v28 = vshrl.u32 %v325_v14, 16  ;;  %v1234_v0 = vsel %vm1114_vm6, %v1229_v46, %v1233_v2  ;;  %v1730_v30 = vor.u32 %v1729_v9, %v1725_v7  ;;  %v1734_v31 = vrot.slane %v1732_v11, 1  ;;  %v699_v50 = vld [vmem:[#allocation2 + $0x2c] sm:$0x1] }
  0x4d   : > { %v401_v32 = vshll.u32 %v325_v14, 16  ;;  %v1903_v34 = vrot.slane %v3519_v15, 1  ;;  %v1904_v35 = vrot.slane %v4170_v37, 1  ;;  %v392_v38 = vrot.slane %v390_v25, 7  ;;  %v914_v56 = vld [vmem:[#allocation2 + $0x78] sm:$0xe] }
  0x4e   : > { %v400_v39 = vrot.slane %v398_v28, 7  ;;  %v1737_v40 = vshrl.u32 %v4150_v57, 16  ;;  %v526_v42 = vshrl.u32 %v340_v20, 16  ;;  %v529_v43 = vshll.u32 %v340_v20, 16  ;;  %v751_v1 = vld [vmem:[#allocation2 + $0x84] sm:$0xf] }
  0x4f   : > { %1309 = vrot.lane.b32.xlu1 %v1138_v61, %s3937_s24  ;;  %1820 = vrot.lane.b32.xlu0 %v1639_v16, %s3939_s26  ;;  %v534_v21 = vshrl.u32 %v341_v29, 16  ;;  %v1741_v45 = vrot.slane %v1739_v17, 1  ;;  %v395_v47 = vor.u32 %v393_v60, %v392_v38  ;;  %v396_v48 = vrot.slane %v392_v38, 4  ;;  %v938_v7 = vld [vmem:[#allocation2 + $0x78] sm:$0xf] }
  0x50   : > { %v403_v49 = vor.u32 %v401_v32, %v400_v39  ;;  %v1735_v37 = vsel %vm1114_vm6, %v1730_v30, %v1734_v31  ;;  %v405_v51 = vrot.slane %v400_v39, 4  ;;  %v528_v54 = vrot.slane %v526_v42, 7  ;;  %v4227_v11 = vld [vmem:[#allocation2 + $0x7c] sm:$0xf]  ;;  %v755_v20 = vld [vmem:[#allocation2 + $0x8c] sm:$0x1] }
  0x51   : > { %v536_v57 = vrot.slane %v534_v21, 7  ;;  %v4211_v58 = vcombine.low %v922_v36, %v4205_v41  ;;  %v696_v61 = vsel %vm4066_vm7, %v395_v47, %v695_v33  ;;  %v537_v63 = vshll.u32 %v341_v29, 16  ;;  %v4233_v16 = vld [vmem:[#allocation2 + $0x20] ss:$0 sps:$4 sm:$0x11]  }
  0x52   : > { %v404_v59 = vsel %vm4074_vm8, %v396_v48, %v403_v49  ;;  %v3526_v46 = vcombine.low %v913_v44, %v4111_v18  ;;  %697 = vst [vmem:[#allocation2 + $0x24] sm:$0xf] %v696_v61  ;;  %v700_v4 = vsel %vm4105_vm9, %v405_v51, %v699_v50  ;;  %v531_v62 = vor.u32 %v529_v43, %v528_v54  ;;  %v4245_v30 = vld [vmem:[#allocation2 + $0x1c] sm:$0xf]  ;;  %v3863_v47 = vld [vmem:[%s5446_s1] sm:$0xff]  }
  0x53   : > { %1325 = vrot.lane.b32.xlu1 %v1234_v0, %s3937_s24  ;;  %1822 = vrot.lane.b32.xlu0 %v1651_v19, %s3939_s26  ;;  %v4218_v3 = vld [vmem:[#allocation2 + $0x80] ss:$0 sps:$4 sm:$0x11]   ;;  %698 = vst.msk [vmem:[#allocation2 + $0x28] sm:$0xf] %vm264_vm0, %v404_v59  ;;  %v532_v5 = vrot.slane %v528_v54, 4  ;;  %v539_v8 = vor.u32 %v537_v63, %v536_v57  ;;  %v3527_v2 = vcombine.low %v914_v56, %v4140_v53 }
  0x54   : > { %701 = vst [vmem:[#allocation2 + $0x2c] sm:$0x1] %v700_v4  ;;  %v1742_v18 = vor.u32 %v1741_v45, %v1737_v40  ;;  %v1744_v9 = vshll.u32 %v4218_v3, 16  ;;  %v752_v13 = vsel %vm4066_vm7, %v531_v62, %v751_v1  ;;  %v1905_v14 = vsel %vm1387_vm2, %v1903_v34, %v1904_v35  ;;  %v797_v0 = vld [vmem:[#allocation2 + $0x18] sm:$0xf]  ;;  %3690 = vmatprep.subr.bf16.mxu0 %v3863_v47 }
  0x55   : > { %v2143_v15 = vshll.u32 %v4211_v58, 16  ;;  %v540_v53 = vsel %vm4074_vm8, %v532_v5, %v539_v8  ;;  %753 = vst [vmem:[#allocation2 + $0x84] sm:$0xf] %v752_v13  ;;  %v1924_v19 = vrot.slane %v3526_v46, 1  ;;  %v1925_v26 = vrot.slane %v4180_v52, 1  ;;  %3728 = vmatprep.subr.bf16.mxu1 %v3863_v47  ;;  %3691 = vmatpush3.bf16.msra.mxu0 %v3863_v47 }
  0x56   : > { %v1746_v17 = vrot.slane %v1744_v9, 1  ;;  %754 = vst.msk [vmem:[#allocation2 + $0x88] sm:$0xf] %vm264_vm0, %v540_v53  ;;  %v541_v25 = vrot.slane %v536_v57, 4  ;;  %v1927_v28 = vrot.slane %v3527_v2, 1  ;;  %v2141_v29 = vshrl.u32 %v4211_v58, 16  ;;  %3731 = vmatpush3.bf16.msra.mxu1 %v3863_v47 }
  0x57   : > { %1836 = vrot.lane.b32.xlu1 %v1735_v37, %s3939_s26  ;;  %1948 = vrot.lane.b32.xlu0 %v1902_v23, %s3940_s27  ;;  %v4240_v23 = vcombine.low %v938_v7, %v4227_v11  ;;  %v970_v52 = vld [vmem:[#allocation2 + $0x18] sm:$0xe]  ;;  %v2145_v33 = vrot.slane %v2143_v15, 1  ;;  %v2148_v34 = vshll.u32 %v4233_v16, 16  ;;  %v1926_v36 = vsel %vm1387_vm2, %v1924_v19, %v1925_v26  ;;  %v4287_v7 = vld [vmem:[#allocation2 + $0x7c] sm:$0xf] }
  0x58   : > { %v1747_v60 = vsel %vm1114_vm6, %v1742_v18, %v1746_v17  ;;  %v756_v35 = vsel %vm4105_vm9, %v541_v25, %v755_v20  ;;  %v1928_v39 = vrot.slane %v4218_v3, 1  ;;  %v4259_v43 = vld [vmem:[#allocation2 + $0x80] ss:$0 sps:$4 sm:$0x11]   ;;  %v4262_v21 = vcombine.low %v797_v0, %v4245_v30  ;;  %v978_v56 = vld [vmem:[#allocation2 + $0x78] sm:$0xe] }
  0x59   : > { %v924_v31 = vld [vmem:[#allocation2 + $0x24] sm:$0xf]  ;;  %757 = vst [vmem:[#allocation2 + $0x8c] sm:$0x1] %v756_v35  ;;  %v2239_v42 = vshll.u32 %v4240_v23, 16  ;;  %v2146_v48 = vor.u32 %v2145_v33, %v2141_v29  ;;  %v2150_v49 = vrot.slane %v2148_v34, 1  ;;  %v3566_v54 = vcombine.low %v970_v52, %v4205_v41 }
  0x5a   : > { %v4248_v32 = vld [vmem:[#allocation2 + $0x28] sm:$0xf]  ;;  %v1929_v57 = vsel %vm1387_vm2, %v1927_v28, %v1928_v39  ;;  %v4278_v61 = vld [vmem:[#allocation2 + $0x20] ss:$0 sps:$4 sm:$0x11]   ;;  %v2237_v63 = vshrl.u32 %v4240_v23, 16  ;;  %v3574_v13 = vcombine.low %v978_v56, %v4227_v11 }
  0x5b   : > { %1950 = vrot.lane.b32.xlu0 %v1905_v14, %s3940_s27  ;;  %1838 = vrot.lane.b32.xlu1 %v1747_v60, %s3939_s26  ;;  %v3535_v38 = vcombine.low %v924_v31, %v4248_v32  ;;  %v4256_v40 = vld [vmem:[#allocation2 + $0x2c] ss:$0 sps:$4 sm:$0x11]   ;;  %v2241_v1 = vrot.slane %v2239_v42, 1  ;;  %v2244_v46 = vshll.u32 %v4259_v43, 16  ;;  %v1142_v3 = vshll.u32 %v4262_v21, 16 }
  0x5c   : > { %v940_v45 = vld [vmem:[#allocation2 + $0x84] sm:$0xf]  ;;  %v2160_v37 = vshll.u32 %v4256_v40, 16  ;;  %v813_v4 = vld [vmem:[#allocation2 + $0x78] sm:$0xf]  ;;  %v3866_v41 = vld [vmem:[%s5446_s1 + $0x8] sm:$0xff]   ;;  %v2151_v8 = vsel %vm1114_vm6, %v2146_v48, %v2150_v49 }
  0x5d   : > { %v2155_v44 = vshll.u32 %v3535_v38, 16  ;;  %v2153_v50 = vshrl.u32 %v3535_v38, 16  ;;  %v4271_v51 = vld [vmem:[#allocation2 + $0x88] sm:$0xf]  ;;  %v971_v62 = vld [vmem:[#allocation2 + $0x24] sm:$0xe]  ;;  %3692 = vmatprep.subr.bf16.mxu0 %v3866_v41  ;;  %3729 = vmatprep.subr.bf16.mxu1 %v3866_v41  ;;  %v2242_v19 = vor.u32 %v2241_v1, %v2237_v63  ;;  %v4306_v28 = vcombine.low %v813_v4, %v4287_v7 }
  0x5e   : > { %v4276_v59 = vcombine.low %v940_v45, %v4271_v51  ;;  %v799_v5 = vld [vmem:[#allocation2 + $0x24] sm:$0xf]  ;;  %v2162_v18 = vrot.slane %v2160_v37, 1  ;;  %v4291_v9 = vld [vmem:[#allocation2 + $0x28] sm:$0xf]  ;;  %v2412_v15 = vrot.slane %v3566_v54, 1  ;;  %3693 = vmatpush3.bf16.msra.mxu0 %v3866_v41  ;;  %3732 = vmatpush3.bf16.msra.mxu1 %v3866_v41  ;;  %v3567_v60 = vcombine.low %v971_v62, %v4248_v32 }
  0x5f   : > { %2060 = vrot.lane.b32.xlu0 %v4211_v58, %s3941_s28  ;;  %1964 = vrot.lane.b32.xlu1 %v1926_v36, %s3940_s27  ;;  %v2157_v58 = vrot.slane %v2155_v44, 1  ;;  %v2413_v53 = vrot.slane %v4233_v16, 1  ;;  %v2246_v26 = vrot.slane %v2244_v46, 1  ;;  %v1140_v20 = vshrl.u32 %v4262_v21, 16  ;;  %v326_v39 = vld [vmem:[%s4053_s22 + $0x18] sm:$0xf] }
  0x60   : > { %v2251_v14 = vshll.u32 %v4276_v59, 16  ;;  %v4296_v17 = vld [vmem:[#allocation2 + $0x8c] ss:$0 sps:$4 sm:$0x11]   ;;  %v1144_v25 = vrot.slane %v1142_v3, 1  ;;  %v1147_v11 = vshll.u32 %v4278_v61, 16  ;;  %v4303_v16 = vcombine.low %v799_v5, %v4291_v9 }
  0x61   : > { %v2158_v2 = vor.u32 %v2157_v58, %v2153_v50  ;;  %v4311_v0 = vld [vmem:[#allocation2 + $0x2c] ss:$0 sps:$4 sm:$0x11]   ;;  %v2414_v52 = vsel %vm1387_vm2, %v2412_v15, %v2413_v53  ;;  %v2249_v31 = vshrl.u32 %v4276_v59, 16  ;;  %v2256_v33 = vshll.u32 %v4296_v17, 16 }
  0x62   : > { %v2253_v32 = vrot.slane %v2251_v14, 1  ;;  %v4316_v34 = vld [vmem:[#allocation2 + $0x80] ss:$0 sps:$4 sm:$0x11]   ;;  %v2247_v35 = vsel %vm1114_vm6, %v2242_v19, %v2246_v26  ;;  %v1145_v36 = vor.u32 %v1144_v25, %v1140_v20  ;;  %v1149_v42 = vrot.slane %v1147_v11, 1 }
  0x63   : > { %2062 = vrot.lane.b32.xlu0 %v3535_v38, %s3941_s28  ;;  %1966 = vrot.lane.b32.xlu1 %v1929_v57, %s3940_s27  ;;  %v2163_v29 = vsel %vm1114_vm6, %v2158_v2, %v2162_v18  ;;  %v2436_v38 = vrot.slane %v3574_v13, 1  ;;  %v2415_v44 = vrot.slane %v3567_v60, 1  ;;  %v1154_v45 = vshll.u32 %v4303_v16, 16  ;;  %v327_v48 = vld [vmem:[%s4053_s22 + $0x1c] sm:$0xf] }
  0x64   : > { %v1238_v47 = vshll.u32 %v4306_v28, 16  ;;  %v2416_v49 = vrot.slane %v4256_v40, 1  ;;  %v1152_v50 = vshrl.u32 %v4303_v16, 16  ;;  %v1159_v37 = vshll.u32 %v4311_v0, 16  ;;  %v843_v54 = vld [vmem:[#allocation2 + $0x18] sm:$0xe] }
  0x65   : > { %v2254_v57 = vor.u32 %v2253_v32, %v2249_v31  ;;  %v2258_v56 = vrot.slane %v2256_v33, 1  ;;  %v815_v58 = vld [vmem:[#allocation2 + $0x84] sm:$0xf]  ;;  %v407_v63 = vshrl.u32 %v326_v39, 16  ;;  %v410_v1 = vshll.u32 %v326_v39, 16 }
  0x66   : > { %v4331_v46 = vld [vmem:[#allocation2 + $0x88] sm:$0xf]  ;;  %v415_v3 = vshrl.u32 %v327_v48, 16  ;;  %v418_v4 = vshll.u32 %v327_v48, 16  ;;  %v979_v41 = vld [vmem:[#allocation2 + $0x84] sm:$0xe]  ;;  %v3472_v18 = vcombine.low %v843_v54, %v4245_v30  ;;  %v2417_v60 = vsel %vm1387_vm2, %v2415_v44, %v2416_v49 }
  0x67   : > { %2332 = vrot.lane.b32.xlu0 %v2151_v8, %s3942_s7  ;;  %2076 = vrot.lane.b32.xlu1 %v4240_v23, %s3941_s28  ;;  %v2437_v23 = vrot.slane %v4259_v43, 1  ;;  %v1236_v43 = vshrl.u32 %v4306_v28, 16  ;;  %v1156_v40 = vrot.slane %v1154_v45, 1  ;;  %v1243_v62 = vshll.u32 %v4316_v34, 16  ;;  %v702_v14 = vld [vmem:[#allocation2 + $0x30] sm:$0xf] }
  0x68   : > { %v409_v5 = vrot.slane %v407_v63, 7  ;;  %v1150_v8 = vsel %vm1114_vm6, %v1145_v36, %v1149_v42  ;;  %v417_v13 = vrot.slane %v415_v3, 7  ;;  %v2259_v15 = vsel %vm1114_vm6, %v2254_v57, %v2258_v56  ;;  %v342_v20 = vld [vmem:[%s4053_s22 + $0x58] sm:$0xf]  ;;  %v343_v31 = vld [vmem:[%s4053_s22 + $0x5c] sm:$0xf] }
  0x69   : > { %v2438_v2 = vsel %vm1387_vm2, %v2436_v38, %v2437_v23  ;;  %v4341_v53 = vcombine.low %v815_v58, %v4331_v46  ;;  %v3575_v25 = vcombine.low %v979_v41, %v4271_v51  ;;  %v1161_v11 = vrot.slane %v1159_v37, 1  ;;  %v706_v36 = vld [vmem:[#allocation2 + $0x38] sm:$0x1]  ;;  %v4351_v38 = vld [vmem:[#allocation2 + $0x8c] ss:$0 sps:$4 sm:$0x11]  }
  0x6a   : > { %v412_v19 = vor.u32 %v410_v1, %v409_v5  ;;  %v413_v26 = vrot.slane %v409_v5, 4  ;;  %v1157_v30 = vor.u32 %v1156_v40, %v1152_v50  ;;  %v1245_v33 = vrot.slane %v1243_v62, 1  ;;  %v758_v50 = vld [vmem:[#allocation2 + $0x90] sm:$0xf]  ;;  %v762_v56 = vld [vmem:[#allocation2 + $0x98] sm:$0x1] }
  0x6b   : > { %2334 = vrot.lane.b32.xlu0 %v2163_v29, %s3942_s7  ;;  %2078 = vrot.lane.b32.xlu1 %v4276_v59, %s3941_s28  ;;  %v1240_v59 = vrot.slane %v1238_v47, 1  ;;  %5461 = vst [vmem:[#allocation3_spill] sm:$0xff] %v4341_v53  ;;  %v844_v29 = vld [vmem:[#allocation2 + $0x24] sm:$0xe]  ;;  %v422_v23 = vrot.slane %v417_v13, 4  ;;  %v543_v39 = vshrl.u32 %v342_v20, 16 }
  0x6c   : > { %v546_v42 = vshll.u32 %v342_v20, 16  ;;  %v3473_v44 = vcombine.low %v844_v29, %v4291_v9  ;;  %v1250_v45 = vshll.u32 %v4341_v53, 16  ;;  %v851_v47 = vld [vmem:[#allocation2 + $0x78] sm:$0xe]  ;;  %v551_v48 = vshrl.u32 %v343_v31, 16 }
  0x6d   : > { %v1241_v32 = vor.u32 %v1240_v59, %v1236_v43  ;;  %v554_v49 = vshll.u32 %v343_v31, 16  ;;  %v1394_v37 = vrot.slane %v3472_v18, 1  ;;  %v1395_v43 = vrot.slane %v4278_v61, 1  ;;  %v328_v3 = vld [vmem:[%s4053_s22 + $0x20] sm:$0xf] }
  0x6e   : > { %v707_v54 = vsel %vm4105_vm9, %v422_v23, %v706_v36  ;;  %v545_v57 = vrot.slane %v543_v39, 7  ;;  %v1162_v9 = vsel %vm1114_vm6, %v1157_v30, %v1161_v11  ;;  %v2439_v58 = vrot.slane %v3575_v25, 1  ;;  %v861_v41 = vld [vmem:[#allocation2 + $0x24] sm:$0xf]  ;;  %v4368_v40 = vld [vmem:[#allocation2 + $0x28] sm:$0xf] }
  0x6f   : > { %2460 = vrot.lane.b32.xlu0 %v2414_v52, %s3943_s8  ;;  %2348 = vrot.lane.b32.xlu1 %v2247_v35, %s3942_s7  ;;  %v420_v52 = vor.u32 %v418_v4, %v417_v13  ;;  %v703_v35 = vsel %vm4066_vm7, %v412_v19, %v702_v14  ;;  %v2440_v63 = vrot.slane %v4296_v17, 1  ;;  %708 = vst [vmem:[#allocation2 + $0x38] sm:$0x1] %v707_v54  ;;  %v553_v1 = vrot.slane %v551_v48, 7  ;;  %v852_v11 = vld [vmem:[#allocation2 + $0x84] sm:$0xe] }
  0x70   : > { %704 = vst [vmem:[#allocation2 + $0x30] sm:$0xf] %v703_v35  ;;  %v1246_v4 = vsel %vm1114_vm6, %v1241_v32, %v1245_v33  ;;  %v1255_v61 = vshll.u32 %v4351_v38, 16  ;;  %v548_v59 = vor.u32 %v546_v42, %v545_v57  ;;  %v549_v62 = vrot.slane %v545_v57, 4  ;;  %v877_v29 = vld [vmem:[#allocation2 + $0x84] sm:$0xf] }
  0x71   : > { %v421_v51 = vsel %vm4074_vm8, %v413_v26, %v420_v52  ;;  %v1248_v5 = vshrl.u32 %v4341_v53, 16  ;;  %v556_v18 = vor.u32 %v554_v49, %v553_v1  ;;  %v558_v13 = vrot.slane %v553_v1, 4  ;;  %v4387_v33 = vld [vmem:[#allocation2 + $0x2c] ss:$0 sps:$4 sm:$0x11]  }
  0x72   : > { %705 = vst.msk [vmem:[#allocation2 + $0x34] sm:$0xf] %vm264_vm0, %v421_v51  ;;  %v1397_v17 = vrot.slane %v3473_v44, 1  ;;  %v3480_v14 = vcombine.low %v851_v47, %v4287_v7  ;;  %v1398_v19 = vrot.slane %v4311_v0, 1  ;;  %v3488_v26 = vcombine.low %v861_v41, %v4368_v40  ;;  %v4389_v35 = vld [vmem:[#allocation2 + $0x88] sm:$0xf] }
  0x73   : > { %1311 = vrot.lane.b32.xlu0 %v1150_v8, %s3937_s24  ;;  %2350 = vrot.lane.b32.xlu1 %v2259_v15, %s3942_s7  ;;  %v1252_v8 = vrot.slane %v1250_v45, 1  ;;  %v424_v15 = vshrl.u32 %v328_v3, 16  ;;  %v557_v20 = vsel %vm4074_vm8, %v549_v62, %v556_v18  ;;  %v763_v25 = vsel %vm4105_vm9, %v558_v13, %v762_v56  ;;  %v329_v36 = vld [vmem:[%s4053_s22 + $0x24] sm:$0xf]  ;;  %v709_v44 = vld [vmem:[#allocation2 + $0x3c] sm:$0xf] }
  0x74   : > { %v1396_v7 = vsel %vm1387_vm2, %v1394_v37, %v1395_v43  ;;  %761 = vst.msk [vmem:[#allocation2 + $0x94] sm:$0xf] %vm264_vm0, %v557_v20  ;;  %764 = vst [vmem:[#allocation2 + $0x98] sm:$0x1] %v763_v25  ;;  %v427_v0 = vshll.u32 %v328_v3, 16  ;;  %v2441_v52 = vsel %vm1387_vm2, %v2439_v58, %v2440_v63  ;;  %v1399_v23 = vsel %vm1387_vm2, %v1397_v17, %v1398_v19 }
  0x75   : > { %v1253_v31 = vor.u32 %v1252_v8, %v1248_v5  ;;  %v426_v51 = vrot.slane %v424_v15, 7  ;;  %v1655_v39 = vshll.u32 %v3488_v26, 16  ;;  %v1418_v42 = vrot.slane %v3480_v14, 1  ;;  %v713_v8 = vld [vmem:[#allocation2 + $0x44] sm:$0x1] }
  0x76   : > { %v1419_v45 = vrot.slane %v4316_v34, 1  ;;  %v3481_v48 = vcombine.low %v852_v11, %v4331_v46  ;;  %v4400_v37 = vcombine.low %v877_v29, %v4389_v35  ;;  %v432_v43 = vshrl.u32 %v329_v36, 16  ;;  %v4410_v41 = vld [vmem:[#allocation2 + $0x38] ss:$0 sps:$4 sm:$0x11]  }
  0x77   : > { %2462 = vrot.lane.b32.xlu0 %v2417_v60, %s3943_s8  ;;  %2476 = vrot.lane.b32.xlu1 %v2438_v2, %s3943_s8  ;;  %v759_v2 = vsel %vm4066_vm7, %v548_v59, %v758_v50  ;;  %v1257_v60 = vrot.slane %v1255_v61, 1  ;;  %v863_v30 = vld [vmem:[#allocation2 + $0x30] sm:$0xf]  ;;  %v429_v49 = vor.u32 %v427_v0, %v426_v51  ;;  %v435_v54 = vshll.u32 %v329_v36, 16  ;;  %v345_v19 = vld [vmem:[%s4053_s22 + $0x64] sm:$0xf] }
  0x78   : > { %760 = vst [vmem:[#allocation2 + $0x90] sm:$0xf] %v759_v2  ;;  %v1653_v57 = vshrl.u32 %v3488_v26, 16  ;;  %v1657_v34 = vrot.slane %v1655_v39, 1  ;;  %v1660_v58 = vshll.u32 %v4387_v33, 16  ;;  %v430_v63 = vrot.slane %v426_v51, 4 }
  0x79   : > { %v4385_v32 = vld [vmem:[#allocation2 + $0x34] sm:$0xf]  ;;  %v1258_v50 = vsel %vm1114_vm6, %v1253_v31, %v1257_v60  ;;  %v710_v56 = vsel %vm4066_vm7, %v429_v49, %v709_v44  ;;  %v434_v46 = vrot.slane %v432_v43, 7  ;;  %v1420_v1 = vsel %vm1387_vm2, %v1418_v42, %v1419_v45  ;;  %v4426_v29 = vld [vmem:[#allocation2 + $0x8c] ss:$0 sps:$4 sm:$0x11]  }
  0x7a   : > { %v3489_v47 = vcombine.low %v863_v30, %v4385_v32  ;;  %711 = vst [vmem:[#allocation2 + $0x3c] sm:$0xf] %v710_v56  ;;  %v1422_v61 = vrot.slane %v4351_v38, 1  ;;  %v1751_v59 = vshll.u32 %v4400_v37, 16  ;;  %v1658_v14 = vor.u32 %v1657_v34, %v1653_v57  ;;  %v907_v38 = vld [vmem:[#allocation2 + $0x24] sm:$0xe] }
  0x7b   : > { %1313 = vrot.lane.b32.xlu0 %v1162_v9, %s3937_s24  ;;  %1327 = vrot.lane.b32.xlu1 %v1246_v4, %s3937_s24  ;;  %v344_v9 = vld [vmem:[%s4053_s22 + $0x60] sm:$0xf]  ;;  %v1421_v4 = vrot.slane %v3481_v48, 1  ;;  %v437_v62 = vor.u32 %v435_v54, %v434_v46  ;;  %v439_v5 = vrot.slane %v434_v46, 4  ;;  %v4413_v17 = vld [vmem:[#allocation2 + $0x94] sm:$0xf]  ;;  %v3520_v39 = vcombine.low %v907_v38, %v4368_v40 }
  0x7c   : > { %v1667_v3 = vshll.u32 %v3489_v47, 16  ;;  %v560_v18 = vshrl.u32 %v344_v9, 16  ;;  %v1662_v2 = vrot.slane %v1660_v58, 1  ;;  %v1665_v20 = vshrl.u32 %v3489_v47, 16  ;;  %v908_v42 = vld [vmem:[#allocation2 + $0x30] sm:$0xe] }
  0x7d   : > { %v438_v15 = vsel %vm4074_vm8, %v430_v63, %v437_v62  ;;  %v714_v60 = vsel %vm4105_vm9, %v439_v5, %v713_v8  ;;  %v1749_v31 = vshrl.u32 %v4400_v37, 16  ;;  %v1753_v30 = vrot.slane %v1751_v59, 1  ;;  %v926_v45 = vld [vmem:[#allocation2 + $0x30] sm:$0xf]  ;;  %v4432_v48 = vld [vmem:[#allocation2 + $0x34] sm:$0xf] }
  0x7e   : > { %v1669_v25 = vrot.slane %v1667_v3, 1  ;;  %712 = vst.msk [vmem:[#allocation2 + $0x40] sm:$0xf] %vm264_vm0, %v438_v15  ;;  %715 = vst [vmem:[#allocation2 + $0x44] sm:$0x1] %v714_v60  ;;  %v562_v0 = vrot.slane %v560_v18, 7  ;;  %v1663_v44 = vsel %vm1114_vm6, %v1658_v14, %v1662_v2  ;;  %v3521_v63 = vcombine.low %v908_v42, %v4385_v32 }
  0x7f   : > { %1440 = vrot.lane.b32.xlu0 %v1396_v7, %s3936_s23  ;;  %2478 = vrot.lane.b32.xlu1 %v2441_v52, %s3943_s8  ;;  %v879_v13 = vld [vmem:[#allocation2 + $0x90] sm:$0xf]  ;;  %v1672_v7 = vshll.u32 %v4410_v41, 16  ;;  %v563_v52 = vshll.u32 %v344_v9, 16  ;;  %v568_v36 = vshrl.u32 %v345_v19, 16  ;;  %v571_v51 = vshll.u32 %v345_v19, 16 }
  0x80   : > { %v3497_v11 = vcombine.low %v879_v13, %v4413_v17  ;;  %v566_v54 = vrot.slane %v562_v0, 4  ;;  %v1756_v9 = vshll.u32 %v4426_v29, 16  ;;  %v4436_v34 = vld [vmem:[#allocation2 + $0x98] ss:$0 sps:$4 sm:$0x11]   ;;  %v1906_v46 = vrot.slane %v3520_v39, 1 }
  0x81   : > { %v565_v49 = vor.u32 %v563_v52, %v562_v0  ;;  %v1674_v43 = vrot.slane %v1672_v7, 1  ;;  %v570_v57 = vrot.slane %v568_v36, 7  ;;  %v769_v3 = vld [vmem:[#allocation2 + $0xa4] sm:$0x1]  ;;  %v915_v5 = vld [vmem:[#allocation2 + $0x84] sm:$0xe] }
  0x82   : > { %v1763_v56 = vshll.u32 %v3497_v11, 16  ;;  %v1758_v8 = vrot.slane %v1756_v9, 1  ;;  %v1761_v18 = vshrl.u32 %v3497_v11, 16  ;;  %v1768_v13 = vshll.u32 %v4436_v34, 16  ;;  %v916_v19 = vld [vmem:[#allocation2 + $0x90] sm:$0xe] }
  0x83   : > { %1442 = vrot.lane.b32.xlu0 %v1399_v23, %s3936_s23  ;;  %1329 = vrot.lane.b32.xlu1 %v1258_v50, %s3937_s24  ;;  %v765_v23 = vld [vmem:[#allocation2 + $0x9c] sm:$0xf]  ;;  %v1670_v50 = vor.u32 %v1669_v25, %v1665_v20  ;;  %v573_v58 = vor.u32 %v571_v51, %v570_v57  ;;  %v575_v62 = vrot.slane %v570_v57, 4  ;;  %v4454_v14 = vld [vmem:[#allocation2 + $0x38] ss:$0 sps:$4 sm:$0x11]   ;;  %v3528_v7 = vcombine.low %v915_v5, %v4389_v35 }
  0x84   : > { %v766_v40 = vsel %vm4066_vm7, %v565_v49, %v765_v23  ;;  %v1765_v32 = vrot.slane %v1763_v56, 1  ;;  %v1909_v2 = vrot.slane %v3521_v63, 1  ;;  %v1910_v15 = vrot.slane %v4410_v41, 1  ;;  %v928_v20 = vld [vmem:[#allocation2 + $0x3c] sm:$0xf] }
  0x85   : > { %767 = vst [vmem:[#allocation2 + $0x9c] sm:$0xf] %v766_v40  ;;  %v574_v59 = vsel %vm4074_vm8, %v566_v54, %v573_v58  ;;  %v4462_v25 = vld [vmem:[#allocation2 + $0x40] sm:$0xf]  ;;  %v1770_v0 = vrot.slane %v1768_v13, 1  ;;  %v2172_v36 = vshll.u32 %v4454_v14, 16  ;;  %v3529_v51 = vcombine.low %v916_v19, %v4413_v17 }
  0x86   : > { %768 = vst.msk [vmem:[#allocation2 + $0xa0] sm:$0xf] %vm264_vm0, %v574_v59  ;;  %v942_v52 = vld [vmem:[#allocation2 + $0x90] sm:$0xf]  ;;  %v1911_v35 = vsel %vm1387_vm2, %v1909_v2, %v1910_v15  ;;  %v4480_v54 = vld [vmem:[#allocation2 + $0x34] sm:$0xf] }
  0x87   : > { %1552 = vrot.lane.b32.xlu0 %v3488_v26, %s3938_s25  ;;  %1456 = vrot.lane.b32.xlu1 %v1420_v1, %s3936_s23  ;;  %v1423_v26 = vsel %vm1387_vm2, %v1421_v4, %v1422_v61  ;;  %v1907_v1 = vrot.slane %v4387_v33, 1  ;;  %v1675_v4 = vsel %vm1114_vm6, %v1670_v50, %v1674_v43  ;;  %v1754_v61 = vor.u32 %v1753_v30, %v1749_v31  ;;  %v4466_v31 = vld [vmem:[#allocation2 + $0x94] sm:$0xf]  ;;  %v972_v42 = vld [vmem:[#allocation2 + $0x30] sm:$0xe] }
  0x88   : > { %v4476_v23 = vcombine.low %v942_v52, %v4466_v31  ;;  %v801_v49 = vld [vmem:[#allocation2 + $0x30] sm:$0xf]  ;;  %v2174_v43 = vrot.slane %v2172_v36, 1  ;;  %v4483_v57 = vld [vmem:[#allocation2 + $0x44] ss:$0 sps:$4 sm:$0x11]   ;;  %v3568_v56 = vcombine.low %v972_v42, %v4432_v48 }
  0x89   : > { %v1908_v38 = vsel %vm1387_vm2, %v1906_v46, %v1907_v1  ;;  %v1759_v60 = vsel %vm1114_vm6, %v1754_v61, %v1758_v8  ;;  %v1933_v9 = vrot.slane %v3529_v51, 1  ;;  %v1934_v40 = vrot.slane %v4436_v34, 1  ;;  %v4490_v46 = vld [vmem:[#allocation2 + $0x98] ss:$0 sps:$4 sm:$0x11]  }
  0x8a   : > { %v2263_v58 = vshll.u32 %v4476_v23, 16  ;;  %v4492_v1 = vld [vmem:[#allocation2 + $0x38] ss:$0 sps:$4 sm:$0x11]   ;;  %v2184_v8 = vshll.u32 %v4483_v57, 16  ;;  %v2418_v13 = vrot.slane %v3568_v56, 1 }
  0x8b   : > { %1554 = vrot.lane.b32.xlu0 %v3489_v47, %s3938_s25  ;;  %1458 = vrot.lane.b32.xlu1 %v1423_v26, %s3936_s23  ;;  %v4441_v47 = vcombine.low %v926_v45, %v4432_v48  ;;  %v1766_v26 = vor.u32 %v1765_v32, %v1761_v18  ;;  %v1931_v45 = vrot.slane %v4426_v29, 1  ;;  %v980_v29 = vld [vmem:[#allocation2 + $0x90] sm:$0xe]  ;;  %v4499_v48 = vcombine.low %v801_v49, %v4480_v54  ;;  %v331_v18 = vld [vmem:[%s4053_s22 + $0x2c] sm:$0xf] }
  0x8c   : > { %v944_v61 = vld [vmem:[#allocation2 + $0x9c] sm:$0xf]  ;;  %v3576_v34 = vcombine.low %v980_v29, %v4466_v31  ;;  %v2265_v2 = vrot.slane %v2263_v58, 1  ;;  %v1935_v15 = vsel %vm1387_vm2, %v1933_v9, %v1934_v40  ;;  %v2268_v19 = vshll.u32 %v4490_v46, 16  ;;  %v716_v56 = vld [vmem:[#allocation2 + $0x48] sm:$0xf] }
  0x8d   : > { %v2167_v33 = vshll.u32 %v4441_v47, 16  ;;  %v2165_v41 = vshrl.u32 %v4441_v47, 16  ;;  %v1771_v39 = vsel %vm1114_vm6, %v1766_v26, %v1770_v0  ;;  %v4496_v59 = vld [vmem:[#allocation2 + $0xa0] sm:$0xf]  ;;  %5462 = vst [vmem:[#allocation4_spill] sm:$0xff] %v4499_v48  ;;  %v1166_v26 = vshll.u32 %v4499_v48, 16 }
  0x8e   : > { %v449_v36 = vshrl.u32 %v331_v18, 16  ;;  %v452_v51 = vshll.u32 %v331_v18, 16  ;;  %v347_v18 = vld [vmem:[%s4053_s22 + $0x6c] sm:$0xf]  ;;  %vm2809_vm10 = vcmask 1041408   ;;  %vm2492_vm11 = vcmask 31744  }
  0x8f   : > { %1824 = vrot.lane.b32.xlu0 %v1663_v44, %s3939_s26  ;;  %1568 = vrot.lane.b32.xlu1 %v4400_v37, %s3938_s25  ;;  %v770_v37 = vsel %vm4105_vm9, %v575_v62, %v769_v3  ;;  %v2169_v30 = vrot.slane %v2167_v33, 1  ;;  %v1930_v44 = vrot.slane %v3528_v7, 1  ;;  %v330_v3 = vld [vmem:[%s4053_s22 + $0x28] sm:$0xf]  ;;  %v2419_v33 = vrot.slane %v4454_v14, 1 }
  0x90   : > { %771 = vst [vmem:[#allocation2 + $0xa4] sm:$0x1] %v770_v37  ;;  %v2261_v37 = vshrl.u32 %v4476_v23, 16  ;;  %v4517_v7 = vld [vmem:[#allocation2 + $0x94] sm:$0xf]  ;;  %v1171_v14 = vshll.u32 %v4492_v1, 16 }
  0x91   : > { %v2170_v50 = vor.u32 %v2169_v30, %v2165_v41  ;;  %v1932_v63 = vsel %vm1387_vm2, %v1930_v44, %v1931_v45  ;;  %v441_v0 = vshrl.u32 %v330_v3, 16  ;;  %v444_v52 = vshll.u32 %v330_v3, 16  ;;  %v803_v30 = vld [vmem:[#allocation2 + $0x3c] sm:$0xf]  ;;  %v4528_v44 = vld [vmem:[#allocation2 + $0x40] sm:$0xf] }
  0x92   : > { %v2186_v41 = vrot.slane %v2184_v8, 1  ;;  %v1168_v40 = vrot.slane %v1166_v26, 1  ;;  %v1173_v29 = vrot.slane %v1171_v14, 1  ;;  %v346_v3 = vld [vmem:[%s4053_s22 + $0x68] sm:$0xf]  ;;  %v585_v26 = vshrl.u32 %v347_v18, 16 }
  0x93   : > { %1826 = vrot.lane.b32.xlu0 %v1675_v4, %s3939_s26  ;;  %1570 = vrot.lane.b32.xlu1 %v3497_v11, %s3938_s25  ;;  %v3537_v11 = vcombine.low %v928_v20, %v4462_v25  ;;  %v2175_v4 = vsel %vm1114_vm6, %v2170_v50, %v2174_v43  ;;  %v817_v20 = vld [vmem:[#allocation2 + $0x90] sm:$0xf]  ;;  %v2270_v43 = vrot.slane %v2268_v19, 1  ;;  %v580_v19 = vshll.u32 %v346_v3, 16 }
  0x94   : > { %v4531_v45 = vcombine.low %v817_v20, %v4517_v7  ;;  %v720_v8 = vld [vmem:[#allocation2 + $0x50] sm:$0x1]  ;;  %v588_v14 = vshll.u32 %v347_v18, 16  ;;  %vm2525_vm12 = vcmask 64512   ;;  %vm2558_vm13 = vcmask 97280  }
  0x95   : > { %v2179_v17 = vshll.u32 %v3537_v11, 16  ;;  %v2177_v62 = vshrl.u32 %v3537_v11, 16  ;;  %vm2591_vm14 = vcmask 130048   ;;  %vm2624_vm15 = vcmask 162816  }
  0x96   : > { %5463 = vst [vmem:[#allocation5_spill] sm:$0xff] %v4531_v45  ;;  %vm2657_vm1 = vcmask 195584   ;;  %vm2690_vm3 = vcmask 228352   ;;  %vm2723_vm4 = vcmask 261120   ;;  %vm2776_vm5 = vcmask 293888  }
  0x97   : > { %1952 = vrot.lane.b32.xlu0 %v1908_v38, %s3940_s27  ;;  %1840 = vrot.lane.b32.xlu1 %v1759_v60, %s3939_s26  ;;  %v2181_v5 = vrot.slane %v2179_v17, 1  ;;  %v1164_v38 = vshrl.u32 %v4499_v48, 16  ;;  %v973_v60 = vld [vmem:[#allocation2 + $0x3c] sm:$0xe]  ;;  %v451_v17 = vrot.slane %v449_v36, 7 }
  0x98   : > { %v4526_v42 = vld [vmem:[#allocation2 + $0xa4] ss:$0 sps:$4 sm:$0x11]   ;;  %v3569_v49 = vcombine.low %v973_v60, %v4462_v25  ;;  %v4543_v25 = vcombine.low %v803_v30, %v4528_v44  ;;  %v4554_v60 = vld [vmem:[#allocation2 + $0x98] ss:$0 sps:$4 sm:$0x11]  }
  0x99   : > { %v2182_v31 = vor.u32 %v2181_v5, %v2177_v62  ;;  %v4540_v62 = vrot.slane %v3576_v34, 1  ;;  %v454_v5 = vor.u32 %v452_v51, %v451_v17  ;;  %v1169_v20 = vor.u32 %v1168_v40, %v1164_v38  ;;  %v4562_v30 = vld [vmem:[#allocation2 + $0x44] ss:$0 sps:$4 sm:$0x11]   ;;  %v790_v48 = vld [vmem:[#allocation2 + $0xc8] sm:$0x1] }
  0x9a   : > { %5464 = vst [vmem:[#allocation6_spill] sm:$0xff] %v4543_v25  ;;  %v1183_v18 = vshll.u32 %v4562_v30, 16 }
  0x9b   : > { %1954 = vrot.lane.b32.xlu0 %v1911_v35, %s3940_s27  ;;  %1842 = vrot.lane.b32.xlu1 %v1771_v39, %s3939_s26  ;;  %v4524_v35 = vsel %vm1387_vm2, %v2418_v13, %v2419_v33  ;;  %v2266_v39 = vor.u32 %v2265_v2, %v2261_v37  ;;  %v2280_v33 = vshll.u32 %v4526_v42, 16  ;;  %v456_v37 = vrot.slane %v451_v17, 4 }
  0x9d   : > { %v2282_v17 = vrot.slane %v2280_v33, 1 }
  0x9f   : > { %2064 = vrot.lane.b32.xlu0 %v4441_v47, %s3941_s28  ;;  %1968 = vrot.lane.b32.xlu1 %v1932_v63, %s3940_s27  ;;  %v4513_v47 = vcombine.low %v944_v61, %v4496_v59  ;;  %v2187_v61 = vsel %vm1114_vm6, %v2182_v31, %v2186_v41  ;;  %v2421_v31 = vrot.slane %v3569_v49, 1  ;;  %v2422_v41 = vrot.slane %v4483_v57, 1 }
  0xa0   : > { %v4507_v32 = vpop.permute.xlu0 %1436  ;;  %v587_v49 = vrot.slane %v585_v26, 7 }
  0xa1   : > { %v2275_v50 = vshll.u32 %v4513_v47, 16  ;;  %v2273_v13 = vshrl.u32 %v4513_v47, 16 }
  0xa3   : > { %2066 = vrot.lane.b32.xlu0 %v3537_v11, %s3941_s28  ;;  %1970 = vrot.lane.b32.xlu1 %v1935_v15, %s3940_s27  ;;  %v443_v11 = vrot.slane %v441_v0, 7  ;;  %v2277_v2 = vrot.slane %v2275_v50, 1  ;;  %v577_v15 = vshrl.u32 %v346_v3, 16  ;;  %v772_v0 = vld [vmem:[#allocation2 + $0xa8] sm:$0xf]  ;;  %v1178_v50 = vshll.u32 %v4543_v25, 16 }
  0xa4   : > { %v4535_v9 = vpop.permute.xlu0 %1307  ;;  %v819_v3 = vld [vmem:[#allocation2 + $0x9c] sm:$0xf] }
  0xa5   : > { %v446_v58 = vor.u32 %v444_v52, %v443_v11  ;;  %v447_v63 = vrot.slane %v443_v11, 4  ;;  %v2271_v52 = vsel %vm1114_vm6, %v2266_v39, %v2270_v43  ;;  %v579_v38 = vrot.slane %v577_v15, 7  ;;  %v332_v43 = vld [vmem:[%s4053_s22 + $0x30] sm:$0xf]  ;;  %v981_v15 = vld [vmem:[#allocation2 + $0x9c] sm:$0xe] }
  0xa6   : > { %v2443_v11 = vrot.slane %v4490_v46, 1  ;;  %v1262_v39 = vshll.u32 %v4531_v45, 16  ;;  %v2278_v57 = vor.u32 %v2277_v2, %v2273_v13  ;;  %v590_v46 = vor.u32 %v588_v14, %v587_v49  ;;  %v845_v13 = vld [vmem:[#allocation2 + $0x30] sm:$0xe] }
  0xa7   : > { %2336 = vrot.lane.b32.xlu0 %v2175_v4, %s3942_s7  ;;  %2080 = vrot.lane.b32.xlu1 %v4476_v23, %s3941_s28  ;;  %v717_v4 = vsel %vm4066_vm7, %v446_v58, %v716_v56  ;;  %v455_v34 = vsel %vm4074_vm8, %v447_v63, %v454_v5  ;;  %v721_v23 = vsel %vm4105_vm9, %v456_v37, %v720_v8  ;;  %v583_v40 = vrot.slane %v579_v38, 4  ;;  %v776_v58 = vld [vmem:[#allocation2 + $0xb0] sm:$0x1] }
  0xa8   : > { %718 = vst [vmem:[#allocation2 + $0x48] sm:$0xf] %v717_v4  ;;  %719 = vst.msk [vmem:[#allocation2 + $0x4c] sm:$0xf] %vm264_vm0, %v455_v34  ;;  %v582_v56 = vor.u32 %v580_v19, %v579_v38  ;;  %v1174_v63 = vsel %vm1114_vm6, %v1169_v20, %v1173_v29  ;;  %v592_v5 = vrot.slane %v587_v49, 4  ;;  %v1176_v8 = vshrl.u32 %v4543_v25, 16 }
  0xa9   : > { %722 = vst [vmem:[#allocation2 + $0x50] sm:$0x1] %v721_v23  ;;  %v4566_v36 = vpop.permute.xlu1 %1564  ;;  %v458_v29 = vshrl.u32 %v332_v43, 16  ;;  %v1180_v4 = vrot.slane %v1178_v50, 1  ;;  %v1267_v37 = vshll.u32 %v4554_v60, 16  ;;  %v591_v2 = vsel %vm4074_vm8, %v583_v40, %v590_v46 }
  0xaa   : > { %v773_v33 = vsel %vm4066_vm7, %v582_v56, %v772_v0  ;;  %v333_v34 = vld [vmem:[%s4053_s22 + $0x34] sm:$0xf]  ;;  %v2283_v19 = vsel %vm1114_vm6, %v2278_v57, %v2282_v17  ;;  %v1264_v23 = vrot.slane %v1262_v39, 1  ;;  %775 = vst.msk [vmem:[#allocation2 + $0xac] sm:$0xf] %vm264_vm0, %v591_v2  ;;  %v461_v14 = vshll.u32 %v332_v43, 16 }
  0xab   : > { %2338 = vrot.lane.b32.xlu0 %v2187_v61, %s3942_s7  ;;  %2082 = vrot.lane.b32.xlu1 %v4513_v47, %s3941_s28  ;;  %v1260_v47 = vshrl.u32 %v4531_v45, 16  ;;  %v4576_v61 = vld [vmem:[#allocation2 + $0xa0] sm:$0xf]  ;;  %774 = vst [vmem:[#allocation2 + $0xa8] sm:$0xf] %v773_v33  ;;  %v2423_v49 = vsel %vm1387_vm2, %v2421_v31, %v2422_v41  ;;  %v1185_v57 = vrot.slane %v1183_v18, 1  ;;  %v3577_v56 = vcombine.low %v981_v15, %v4496_v59 }
  0xac   : > { %v4595_v26 = vcombine.low %v819_v3, %v4576_v61  ;;  %v846_v38 = vld [vmem:[#allocation2 + $0x3c] sm:$0xe]  ;;  %v4601_v50 = vld [vmem:[#allocation2 + $0xa4] ss:$0 sps:$4 sm:$0x11]   ;;  %v460_v39 = vrot.slane %v458_v29, 7  ;;  %v2444_v43 = vsel %vm1387_vm2, %v4540_v62, %v2443_v11  ;;  %v1181_v40 = vor.u32 %v1180_v4, %v1176_v8 }
  0xad   : > { %v4568_v51 = vpop.permute.xlu0 %1548  ;;  %v466_v17 = vshrl.u32 %v333_v34, 16  ;;  %v3869_v3 = vld [vmem:[%s5446_s1 + $0x10] ss:$0 sps:$4 sm:$0x33]   ;;  %v1269_v46 = vrot.slane %v1267_v37, 1  ;;  %v1401_v59 = vrot.slane %v4492_v1, 1  ;;  %v3475_v11 = vcombine.low %v846_v38, %v4528_v44 }
  0xae   : > { %5465 = vst [vmem:[#allocation7_spill] sm:$0xff] %v4595_v26  ;;  %v1274_v31 = vshll.u32 %v4595_v26, 16  ;;  %v463_v41 = vor.u32 %v461_v14, %v460_v39  ;;  %v464_v18 = vrot.slane %v460_v39, 4  ;;  %v1279_v8 = vshll.u32 %v4601_v50, 16  ;;  %v865_v33 = vld [vmem:[#allocation2 + $0x3c] sm:$0xf]  ;;  %3734 = vmatprep.subr.msk.bf16.mxu0 %vm2809_vm10, %v3869_v3  ;;  %3735 = vmatprep.subr.msk.bf16.mxu1 %vm2809_vm10, %v3869_v3 }
  0xaf   : > { %2464 = vrot.lane.b32.xlu0 %v4524_v35, %s3943_s8  ;;  %2352 = vrot.lane.b32.xlu1 %v2271_v52, %s3942_s7  ;;  %v777_v35 = vsel %vm4105_vm9, %v592_v5, %v776_v58  ;;  %v4598_v0 = vpop.permute.xlu1 %1566  ;;  %v3474_v52 = vcombine.low %v845_v13, %v4480_v54  ;;  %v469_v58 = vshll.u32 %v333_v34, 16  ;;  %v723_v54 = vld [vmem:[#allocation2 + $0x54] sm:$0xf]  ;;  %v468_v13 = vrot.slane %v466_v17, 7  ;;  %v4626_v2 = vld [vmem:[#allocation2 + $0x40] sm:$0xf] }
  0xb0   : > { %778 = vst [vmem:[#allocation2 + $0xb0] sm:$0x1] %v777_v35  ;;  %v1186_v1 = vsel %vm1114_vm6, %v1181_v40, %v1185_v57  ;;  %v2445_v4 = vrot.slane %v3577_v56, 1  ;;  %v2446_v37 = vrot.slane %v4526_v42, 1  ;;  %v1272_v34 = vshrl.u32 %v4595_v26, 16 }
  0xb1   : > { %v1400_v5 = vrot.slane %v3474_v52, 1  ;;  %v471_v44 = vor.u32 %v469_v58, %v468_v13  ;;  %v1276_v15 = vrot.slane %v1274_v31, 1  ;;  %v348_v52 = vld [vmem:[%s4053_s22 + $0x70] sm:$0xf]  ;;  %v1403_v42 = vrot.slane %v3475_v11, 1 }
  0xb2   : > { %v4592_v20 = vpop.permute.xlu0 %1550  ;;  %v1404_v38 = vrot.slane %v4562_v30, 1  ;;  %v4636_v57 = vcombine.low %v865_v33, %v4626_v2  ;;  %v2447_v56 = vsel %vm1387_vm2, %v2445_v4, %v2446_v37  ;;  %v349_v40 = vld [vmem:[%s4053_s22 + $0x74] sm:$0xf]  ;;  %v594_v31 = vshrl.u32 %v348_v52, 16  ;;  %v4655_v33 = vld [vmem:[#allocation2 + $0xa0] sm:$0xf] }
  0xb3   : > { %1315 = vrot.lane.b32.xlu0 %v1174_v63, %s3937_s24  ;;  %2354 = vrot.lane.b32.xlu1 %v2283_v19, %s3942_s7  ;;  %v1265_v63 = vor.u32 %v1264_v23, %v1260_v47  ;;  %v724_v47 = vsel %vm4066_vm7, %v463_v41, %v723_v54  ;;  %v2811_v19 = vsel %vm2809_vm10, %v3869_v3, 0  ;;  %v853_v23 = vld [vmem:[#allocation2 + $0x90] sm:$0xe]  ;;  %v472_v14 = vsel %vm4074_vm8, %v464_v18, %v471_v44  ;;  %v867_v3 = vld [vmem:[#allocation2 + $0x48] sm:$0xf] }
  0xb4   : > { %725 = vst [vmem:[#allocation2 + $0x54] sm:$0xf] %v724_v47  ;;  %3695 = vmatpush3.bf16.msra.mxu0 %v2811_v19  ;;  %3733 = vmatpush3.bf16.msra.mxu1 %v2811_v19  ;;  %726 = vst.msk [vmem:[#allocation2 + $0x58] sm:$0xf] %vm264_vm0, %v472_v14  ;;  %v1402_v17 = vsel %vm1387_vm2, %v1400_v5, %v1401_v59  ;;  %v1277_v54 = vor.u32 %v1276_v15, %v1272_v34  ;;  %v854_v41 = vld [vmem:[#allocation2 + $0x9c] sm:$0xe] }
  0xb5   : > { %v1270_v35 = vsel %vm1114_vm6, %v1265_v63, %v1269_v46  ;;  %v3482_v30 = vcombine.low %v853_v23, %v4517_v7  ;;  %v4648_v63 = vld [vmem:[#allocation2 + $0x4c] sm:$0xf]  ;;  %v473_v46 = vrot.slane %v468_v13, 4  ;;  %v4650_v18 = vld [vmem:[#allocation2 + $0x44] ss:$0 sps:$4 sm:$0x11]   ;;  %v1405_v5 = vsel %vm1387_vm2, %v1403_v42, %v1404_v38 }
  0xb6   : > { %v4615_v62 = vpop.permute.xlu0 %1438  ;;  %v597_v11 = vshll.u32 %v348_v52, 16  ;;  %v1679_v59 = vshll.u32 %v4636_v57, 16  ;;  %v596_v47 = vrot.slane %v594_v31, 7  ;;  %v3491_v4 = vcombine.low %v867_v3, %v4648_v63  ;;  %v909_v3 = vld [vmem:[#allocation2 + $0x3c] sm:$0xe] }
  0xb7   : > { %2466 = vrot.lane.b32.xlu0 %v2423_v49, %s3943_s8  ;;  %2480 = vrot.lane.b32.xlu1 %v2444_v43, %s3943_s8  ;;  %v1281_v49 = vrot.slane %v1279_v8, 1  ;;  %v727_v43 = vld [vmem:[#allocation2 + $0x5c] sm:$0x1]  ;;  %v602_v37 = vshrl.u32 %v349_v40, 16  ;;  %v605_v44 = vshll.u32 %v349_v40, 16  ;;  %v1424_v19 = vrot.slane %v3482_v30, 1 }
  0xb8   : > { %v881_v8 = vld [vmem:[#allocation2 + $0x9c] sm:$0xf]  ;;  %v728_v7 = vsel %vm4105_vm9, %v473_v46, %v727_v43  ;;  %v3483_v23 = vcombine.low %v854_v41, %v4576_v61  ;;  %v599_v14 = vor.u32 %v597_v11, %v596_v47  ;;  %v1684_v52 = vshll.u32 %v4650_v18, 16  ;;  %v4679_v40 = vld [vmem:[#allocation2 + $0x50] ss:$0 sps:$4 sm:$0x11]  }
  0xb9   : > { %v4622_v29 = vpop.permute.xlu1 %1452  ;;  %729 = vst [vmem:[#allocation2 + $0x5c] sm:$0x1] %v728_v7  ;;  %v1282_v15 = vsel %vm1114_vm6, %v1277_v54, %v1281_v49  ;;  %v4670_v42 = vcombine.low %v881_v8, %v4655_v33  ;;  %v604_v38 = vrot.slane %v602_v37, 7  ;;  %v1691_v61 = vshll.u32 %v3491_v4, 16  ;;  %v4686_v8 = vld [vmem:[#allocation2 + $0xac] sm:$0xf] }
  0xba   : > { %v1427_v31 = vrot.slane %v3483_v23, 1  ;;  %v1428_v41 = vrot.slane %v4601_v50, 1  ;;  %v1686_v11 = vrot.slane %v1684_v52, 1  ;;  %v4688_v7 = vld [vmem:[#allocation2 + $0xa4] ss:$0 sps:$4 sm:$0x11]  }
  0xbb   : > { %1317 = vrot.lane.b32.xlu0 %v1186_v1, %s3937_s24  ;;  %1331 = vrot.lane.b32.xlu1 %v1270_v35, %s3937_s24  ;;  %v1425_v1 = vrot.slane %v4554_v60, 1  ;;  %v779_v35 = vld [vmem:[#allocation2 + $0xb4] sm:$0xf]  ;;  %v600_v60 = vrot.slane %v596_v47, 4  ;;  %v607_v54 = vor.u32 %v605_v44, %v604_v38  ;;  %v783_v37 = vld [vmem:[#allocation2 + $0xbc] sm:$0x1] }
  0xbc   : > { %v780_v43 = vsel %vm4066_vm7, %v599_v14, %v779_v35  ;;  %v4694_v35 = vld [vmem:[#allocation2 + $0x4c] sm:$0xf]  ;;  %v1696_v23 = vshll.u32 %v4679_v40, 16  ;;  %v910_v52 = vld [vmem:[#allocation2 + $0x48] sm:$0xe] }
  0xbd   : > { %v4640_v39 = vpop.permute.xlu1 %1454  ;;  %v4645_v58 = vpop.permute.xlu0 %1323  ;;  %781 = vst [vmem:[#allocation2 + $0xb4] sm:$0xf] %v780_v43  ;;  %v1426_v46 = vsel %vm1387_vm2, %v1424_v19, %v1425_v1  ;;  %v608_v47 = vsel %vm4074_vm8, %v600_v60, %v607_v54  ;;  %v930_v1 = vld [vmem:[#allocation2 + $0x48] sm:$0xf]  ;;  %v1693_v19 = vrot.slane %v1691_v61, 1  ;;  %v1429_v60 = vsel %vm1387_vm2, %v1427_v31, %v1428_v41 }
  0xbe   : > { %782 = vst.msk [vmem:[#allocation2 + $0xb8] sm:$0xf] %vm264_vm0, %v608_v47  ;;  %v4707_v43 = vcombine.low %v930_v1, %v4694_v35  ;;  %v1773_v54 = vshrl.u32 %v4670_v42, 16  ;;  %v3523_v31 = vcombine.low %v910_v52, %v4648_v63  ;;  %v1698_v41 = vrot.slane %v1696_v23, 1 }
  0xbf   : > { %1444 = vrot.lane.b32.xlu0 %v1402_v17, %s3936_s23  ;;  %2482 = vrot.lane.b32.xlu1 %v2447_v56, %s3943_s8  ;;  %v1677_v17 = vshrl.u32 %v4636_v57, 16  ;;  %v1681_v56 = vrot.slane %v1679_v59, 1  ;;  %v883_v59 = vld [vmem:[#allocation2 + $0xa8] sm:$0xf]  ;;  %v2494_v63 = vsel %vm2492_vm11, %v4058_v10, %v4535_v9  ;;  %v2510_v25 = vsel %vm2492_vm11, %v4165_v24, %v4645_v58 }
  0xc0   : > { %v918_v10 = vld [vmem:[#allocation2 + $0xa8] sm:$0xe] }
  0xc1   : > { %v4660_v13 = vpop.permute.xlu1 %1309  ;;  %v4664_v34 = vpop.permute.xlu0 %1820  ;;  %v1682_v44 = vor.u32 %v1681_v56, %v1677_v17  ;;  %v609_v17 = vrot.slane %v604_v38, 4  ;;  %v3522_v56 = vcombine.low %v909_v3, %v4626_v2  ;;  %v1780_v2 = vshll.u32 %v4688_v7, 16 }
  0xc2   : > { %v2496_v24 = vsel %vm2492_vm11, %v4143_v55, %v4660_v13 }
  0xc3   : > { %1446 = vrot.lane.b32.xlu0 %v1405_v5, %s3936_s23  ;;  %1333 = vrot.lane.b32.xlu1 %v1282_v15, %s3937_s24  ;;  %v1775_v5 = vshll.u32 %v4670_v42, 16  ;;  %v1689_v15 = vshrl.u32 %v3491_v4, 16  ;;  %v1687_v61 = vsel %vm1114_vm6, %v1682_v44, %v1686_v11  ;;  %v784_v47 = vsel %vm4105_vm9, %v609_v17, %v783_v37  ;;  %v4724_v37 = vld [vmem:[#allocation2 + $0x50] ss:$0 sps:$4 sm:$0x11]  }
  0xc4   : > { %785 = vst [vmem:[#allocation2 + $0xbc] sm:$0x1] %v784_v47  ;;  %v917_v44 = vld [vmem:[#allocation2 + $0x9c] sm:$0xe]  ;;  %v1912_v1 = vrot.slane %v3522_v56, 1  ;;  %v1782_v52 = vrot.slane %v1780_v2, 1  ;;  %v2527_v2 = vsel %vm2525_vm12, %v2494_v63, %v4507_v32 }
  0xc5   : > { %v4677_v49 = vpop.permute.xlu1 %1325  ;;  %v4681_v30 = vpop.permute.xlu0 %1822  ;;  %v1694_v38 = vor.u32 %v1693_v19, %v1689_v15  ;;  %v1913_v15 = vrot.slane %v4650_v18, 1  ;;  %v1916_v17 = vrot.slane %v4679_v40, 1  ;;  %v2189_v18 = vshrl.u32 %v4707_v43, 16  ;;  %v932_v40 = vld [vmem:[#allocation2 + $0x54] sm:$0xf] }
  0xc7   : > { %1556 = vrot.lane.b32.xlu0 %v4636_v57, %s3938_s25  ;;  %1460 = vrot.lane.b32.xlu1 %v1426_v46, %s3936_s23  ;;  %v3499_v57 = vcombine.low %v883_v59, %v4686_v8  ;;  %v1777_v46 = vrot.slane %v1775_v5, 1  ;;  %v4719_v59 = vld [vmem:[#allocation2 + $0xb0] ss:$0 sps:$4 sm:$0x11]   ;;  %v2191_v5 = vshll.u32 %v4707_v43, 16  ;;  %v1699_v23 = vsel %vm1114_vm6, %v1694_v38, %v1698_v41 }
  0xc8   : > { %v1792_v56 = vshll.u32 %v4719_v59, 16  ;;  %v2196_v38 = vshll.u32 %v4724_v37, 16  ;;  %v4744_v41 = vld [vmem:[#allocation2 + $0xac] sm:$0xf] }
  0xc9   : > { %v4698_v50 = vpop.permute.xlu1 %1836  ;;  %v4701_v14 = vpop.permute.xlu0 %1948  ;;  %v1778_v19 = vor.u32 %v1777_v46, %v1773_v54  ;;  %v1785_v9 = vshrl.u32 %v3499_v57, 16  ;;  %v3530_v54 = vcombine.low %v917_v44, %v4655_v33  ;;  %v1914_v33 = vsel %vm1387_vm2, %v1912_v1, %v1913_v15  ;;  %v4751_v44 = vld [vmem:[#allocation2 + $0x58] sm:$0xf] }
  0xca   : > { %v1794_v45 = vrot.slane %v1792_v56, 1  ;;  %v1937_v15 = vrot.slane %v4688_v7, 1  ;;  %v805_v56 = vld [vmem:[#allocation2 + $0x48] sm:$0xf] }
  0xcb   : > { %1558 = vrot.lane.b32.xlu0 %v3491_v4, %s3938_s25  ;;  %1462 = vrot.lane.b32.xlu1 %v1429_v60, %s3936_s23  ;;  %v1787_v4 = vshll.u32 %v3499_v57, 16  ;;  %v1915_v60 = vrot.slane %v3523_v31, 1  ;;  %v946_v31 = vld [vmem:[#allocation2 + $0xa8] sm:$0xf]  ;;  %v1783_v26 = vsel %vm1114_vm6, %v1778_v19, %v1782_v52  ;;  %v4768_v19 = vcombine.low %v932_v40, %v4751_v44 }
  0xcc   : > { %v4762_v63 = vcombine.low %v946_v31, %v4744_v41  ;;  %v351_v31 = vld [vmem:[%s4053_s22 + $0x7c] sm:$0xf] }
  0xcd   : > { %v4717_v3 = vpop.permute.xlu0 %1950  ;;  %v4721_v11 = vpop.permute.xlu1 %1838  ;;  %v1917_v1 = vsel %vm1387_vm2, %v1915_v60, %v1916_v17  ;;  %v2203_v13 = vshll.u32 %v4768_v19, 16  ;;  %v4864_v53 = vld [vmem:[#allocation2 + $0xbc] ss:$0 sps:$4 sm:$0x11]  }
  0xce   : > { %v2287_v55 = vshll.u32 %v4762_v63, 16 }
  0xcf   : > { %1828 = vrot.lane.b32.xlu0 %v1687_v61, %s3939_s26  ;;  %1572 = vrot.lane.b32.xlu1 %v4670_v42, %s3938_s25  ;;  %v1789_v61 = vrot.slane %v1787_v4, 1  ;;  %v2193_v42 = vrot.slane %v2191_v5, 1  ;;  %v3531_v4 = vcombine.low %v918_v10, %v4686_v8  ;;  %v974_v8 = vld [vmem:[#allocation2 + $0x48] sm:$0xe]  ;;  %v1940_v10 = vrot.slane %v4719_v59, 1 }
  0xd0   : > { %v3570_v17 = vcombine.low %v974_v8, %v4694_v35  ;;  %v4793_v35 = vld [vmem:[#allocation2 + $0x5c] ss:$0 sps:$4 sm:$0x11]  }
  0xd1   : > { %v4735_v47 = vpop.permute.xlu0 %2060  ;;  %v4740_v46 = vpop.permute.xlu1 %1964  ;;  %v2194_v52 = vor.u32 %v2193_v42, %v2189_v18  ;;  %v1939_v58 = vrot.slane %v3531_v4, 1  ;;  %v4779_v18 = vld [vmem:[#allocation2 + $0x4c] sm:$0xf] }
  0xd2   : > { %v4805_v42 = vcombine.low %v805_v56, %v4779_v18  ;;  %v4813_v4 = vrot.slane %v3570_v17, 1  ;;  %v619_v56 = vshrl.u32 %v351_v31, 16 }
  0xd3   : > { %1830 = vrot.lane.b32.xlu0 %v1699_v23, %s3939_s26  ;;  %1574 = vrot.lane.b32.xlu1 %v3499_v57, %s3938_s25  ;;  %v1790_v23 = vor.u32 %v1789_v61, %v1785_v9  ;;  %v1936_v57 = vrot.slane %v3530_v54, 1  ;;  %v2198_v9 = vrot.slane %v2196_v38, 1  ;;  %v2543_v61 = vsel %vm2525_vm12, %v2510_v25, %v4622_v29  ;;  %v4790_v29 = vld [vmem:[#allocation2 + $0x54] sm:$0xe]  ;;  %v350_v38 = vld [vmem:[%s4053_s22 + $0x78] sm:$0xf]  ;;  %s5314_s22 = scalar_lea.vmem %s5449_s4, %s3637_s19 }
  0xd4   : > { %v2560_v25 = vsel %vm2558_vm13, %v2527_v2, %v4568_v51  ;;  %v4797_v59 = vsel %vm2558_vm13, %v2543_v61, %v4566_v36  ;;  %v1941_v51 = vsel %vm1387_vm2, %v1939_v58, %v1940_v10  ;;  %v2205_v10 = vrot.slane %v2203_v13, 1  ;;  %v821_v36 = vld [vmem:[#allocation2 + $0xa8] sm:$0xf] }
  0xd5   : > { %v4753_v5 = vpop.permute.xlu0 %2062  ;;  %v4759_v32 = vpop.permute.xlu1 %1966  ;;  %v1795_v7 = vsel %vm1114_vm6, %v1790_v23, %v1794_v45  ;;  %v2529_v45 = vsel %vm2525_vm12, %v2496_v24, %v4615_v62  ;;  %v4802_v62 = vsel %vm1114_vm6, %v2194_v52, %v2198_v9  ;;  %v2593_v40 = vsel %vm2591_vm14, %v2560_v25, %v4664_v34  ;;  %v4826_v52 = vld [vmem:[#allocation2 + $0xb8] sm:$0xf]  ;;  %v786_v25 = vld [vmem:[#allocation2 + $0xc0] sm:$0xf] }
  0xd6   : > { %v2285_v23 = vshrl.u32 %v4762_v63, 16  ;;  %v2562_v8 = vsel %vm2558_vm13, %v2529_v45, %v4592_v20  ;;  %v2201_v34 = vshrl.u32 %v4768_v19, 16  ;;  %v2289_v24 = vrot.slane %v2287_v55, 1 }
  0xd7   : > { %1956 = vrot.lane.b32.xlu0 %v1914_v33, %s3940_s27  ;;  %1844 = vrot.lane.b32.xlu1 %v1783_v26, %s3939_s26  ;;  %v1938_v26 = vsel %vm1387_vm2, %v1936_v57, %v1937_v15  ;;  %v4816_v33 = vld [vmem:[#allocation2 + $0xb0] ss:$0 sps:$4 sm:$0x11]   ;;  %v948_v15 = vld [vmem:[#allocation2 + $0xb4] sm:$0xf]  ;;  %v2626_v58 = vsel %vm2624_vm15, %v2593_v40, %v4701_v14  ;;  %v2208_v20 = vshll.u32 %v4793_v35, 16  ;;  %v2512_v14 = vsel %vm2492_vm11, %v4160_v6, %v4677_v49 }
  0xd8   : > { %v611_v9 = vshrl.u32 %v350_v38, 16  ;;  %v2659_v61 = vsel %vm2657_vm1, %v2626_v58, %v4735_v47  ;;  %v614_v17 = vshll.u32 %v350_v38, 16  ;;  %v622_v55 = vshll.u32 %v351_v31, 16  ;;  %v807_v40 = vld [vmem:[#allocation2 + $0x54] sm:$0xf] }
  0xd9   : > { %v2333_v60 = vpop.permute.xlu0 %2332  ;;  %v4781_v54 = vpop.permute.xlu1 %2076  ;;  %v4843_v13 = vcombine.low %v948_v15, %v4826_v52  ;;  %v4845_v47 = vld [vmem:[#allocation2 + $0x58] sm:$0xf]  ;;  %v2595_v38 = vsel %vm2591_vm14, %v2562_v8, %v4681_v30  ;;  %v4851_v6 = vld [vmem:[#allocation2 + $0xac] sm:$0xf]  ;;  %v621_v49 = vrot.slane %v619_v56, 7  ;;  %v1190_v15 = vshll.u32 %v4805_v42, 16 }
  0xda   : > { %v2206_v30 = vor.u32 %v2205_v10, %v2201_v34  ;;  %v2210_v8 = vrot.slane %v2208_v20, 1  ;;  %v1188_v20 = vshrl.u32 %v4805_v42, 16  ;;  %v2628_v22 = vsel %vm2624_vm15, %v2595_v38, %v4717_v3 }
  0xdb   : > { %1958 = vrot.lane.b32.xlu0 %v1917_v1, %s3940_s27  ;;  %1846 = vrot.lane.b32.xlu1 %v1795_v7, %s3939_s26  ;;  %v4836_v7 = vld [vmem:[#allocation2 + $0x50] ss:$0 sps:$4 sm:$0x11]   ;;  %v2292_v1 = vshll.u32 %v4816_v33, 16  ;;  %v2297_v3 = vshrl.u32 %v4843_v13, 16 }
  0xdd   : > { %v4811_v2 = vpop.permute.xlu0 %2334  ;;  %v4821_v57 = vpop.permute.xlu1 %2078  ;;  %v2294_v10 = vrot.slane %v2292_v1, 1  ;;  %v1192_v1 = vrot.slane %v1190_v15, 1 }
  0xdf   : > { %2068 = vrot.lane.b32.xlu0 %v4707_v43, %s3941_s28  ;;  %1972 = vrot.lane.b32.xlu1 %v1938_v26, %s3940_s27  ;;  %v2692_v43 = vsel %vm2690_vm3, %v2659_v61, %v2333_v60  ;;  %v613_v26 = vrot.slane %v611_v9, 7  ;;  %v2290_v60 = vor.u32 %v2289_v24, %v2285_v23  ;;  %v4867_v23 = vcombine.low %v821_v36, %v4851_v6 }
  0xe0   : > { %v2609_v36 = vsel %vm2591_vm14, %v4797_v59, %v4698_v50  ;;  %v2211_v50 = vsel %vm1114_vm6, %v2206_v30, %v2210_v8  ;;  %v4922_v8 = vld [vmem:[#allocation2 + $0xb0] ss:$0 sps:$4 sm:$0x11]  }
  0xe1   : > { %v2461_v45 = vpop.permute.xlu0 %2460  ;;  %v2349_v58 = vpop.permute.xlu1 %2348  ;;  %v616_v9 = vor.u32 %v614_v17, %v613_v26  ;;  %v617_v61 = vrot.slane %v613_v26, 4  ;;  %v1195_v17 = vshll.u32 %v4836_v7, 16  ;;  %v2642_v27 = vsel %vm2624_vm15, %v2609_v36, %v4740_v46 }
  0xe2   : > { %v2725_v31 = vsel %vm2723_vm4, %v2692_v43, %v2461_v45  ;;  %v4859_v43 = vcombine.low %v807_v40, %v4845_v47  ;;  %v624_v45 = vor.u32 %v622_v55, %v621_v49  ;;  %v2661_v26 = vsel %vm2657_vm1, %v2628_v22, %v4753_v5 }
  0xe3   : > { %2070 = vrot.lane.b32.xlu0 %v4768_v19, %s3941_s28  ;;  %3696 = vmatprep.mubr.msk.bf16.mxu0 %vm2776_vm5, %v2725_v31  ;;  %v2299_v19 = vshll.u32 %v4843_v13, 16  ;;  %v787_v24 = vsel %vm4066_vm7, %v616_v9, %v786_v25  ;;  %v982_v25 = vld [vmem:[#allocation2 + $0xa8] sm:$0xe]  ;;  %v2675_v59 = vsel %vm2657_vm1, %v2642_v27, %v4781_v54  ;;  %v2694_v12 = vsel %vm2690_vm3, %v2661_v26, %v4811_v2  ;;  %v4908_v9 = vld [vmem:[#allocation2 + $0x5c] ss:$0 sps:$4 sm:$0x11]  }
  0xe4   : > { %1974 = vrot.lane.b32.xlu1 %v1941_v51, %s3940_s27  ;;  %v626_v51 = vrot.slane %v621_v49, 4  ;;  %v625_v55 = vsel %vm4074_vm8, %v617_v61, %v624_v45  ;;  %788 = vst [vmem:[#allocation2 + $0xc0] sm:$0xf] %v787_v24  ;;  %v2304_v46 = vshll.u32 %v4864_v53, 16  ;;  %v2708_v5 = vsel %vm2690_vm3, %v2675_v59, %v2349_v58 }
  0xe5   : > { %v4861_v56 = vpop.permute.xlu0 %1311  ;;  %v4871_v34 = vpop.permute.xlu1 %2350  ;;  %789 = vst.msk [vmem:[#allocation2 + $0xc4] sm:$0xf] %vm264_vm0, %v625_v55  ;;  %v3578_v38 = vcombine.low %v982_v25, %v4744_v41  ;;  %v2545_v49 = vsel %vm2525_vm12, %v2512_v14, %v4640_v39  ;;  %v1193_v2 = vor.u32 %v1192_v1, %v1188_v20  ;;  %v1197_v15 = vrot.slane %v1195_v17, 1  ;;  %v983_v1 = vld [vmem:[#allocation2 + $0xb4] sm:$0xe] }
  0xe6   : > { %v791_v40 = vsel %vm4105_vm9, %v626_v51, %v790_v48  ;;  %v5466_v41 = vrot.slane %v4724_v37, 1  ;;  %v2295_v14 = vsel %vm1114_vm6, %v2290_v60, %v2294_v10  ;;  %v5467_v58 = vcombine.low %v4790_v29, %v4751_v44  ;;  %v823_v29 = vld [vmem:[#allocation2 + $0xb4] sm:$0xf]  ;;  %v4933_v10 = vld [vmem:[#allocation2 + $0xb8] sm:$0xf] }
  0xe7   : > { %2340 = vrot.lane.b32.xlu0 %v4802_v62, %s3942_s7  ;;  %792 = vst [vmem:[#allocation2 + $0xc8] sm:$0x1] %v791_v40  ;;  %v2301_v62 = vrot.slane %v2299_v19, 1  ;;  %v1202_v30 = vshll.u32 %v4859_v43, 16  ;;  %v2306_v19 = vrot.slane %v2304_v46, 1  ;;  %v2428_v24 = vrot.slane %v4793_v35, 1 }
  0xe8   : > { %2084 = vrot.lane.b32.xlu1 %v4762_v63, %s3941_s28  ;;  %v2426_v39 = vsel %vm1387_vm2, %v4813_v4, %v5466_v41  ;;  %v2427_v61 = vrot.slane %v5467_v58, 1  ;;  %v1286_v37 = vshll.u32 %v4867_v23, 16  ;;  %v2578_v4 = vsel %vm2558_vm13, %v2545_v49, %v4598_v0  ;;  %v847_v0 = vld [vmem:[#allocation2 + $0x48] sm:$0xe]  ;;  %v869_v58 = vld [vmem:[#allocation2 + $0x54] sm:$0xf] }
  0xe9   : > { %v2463_v48 = vpop.permute.xlu0 %2462  ;;  %v2477_v31 = vpop.permute.xlu1 %2476  ;;  %v2448_v51 = vrot.slane %v3578_v38, 1  ;;  %v2449_v44 = vrot.slane %v4816_v33, 1  ;;  %v2611_v20 = vsel %vm2591_vm14, %v2578_v4, %v4721_v11  ;;  %v1198_v35 = vsel %vm1114_vm6, %v1193_v2, %v1197_v15  ;;  %v4966_v49 = vld [vmem:[#allocation2 + $0xbc] ss:$0 sps:$4 sm:$0x11]  }
  0xea   : > { %v2727_v63 = vsel %vm2723_vm4, %v2694_v12, %v2463_v48  ;;  %v2741_v54 = vsel %vm2723_vm4, %v2708_v5, %v2477_v31  ;;  %v1200_v17 = vshrl.u32 %v4859_v43, 16  ;;  %v1207_v55 = vshll.u32 %v4908_v9, 16  ;;  %v848_v5 = vld [vmem:[#allocation2 + $0x54] sm:$0xe]  ;;  %v855_v4 = vld [vmem:[#allocation2 + $0xa8] sm:$0xe] }
  0xeb   : > { %2342 = vrot.lane.b32.xlu0 %v2211_v50, %s3942_s7  ;;  %3697 = vmatmul.mubr.msk.bf16.vlgmr.msra.gmra.mrb[0].mxu0 %vm2776_vm5, %v2727_v63  ;;  %v2644_v36 = vsel %vm2624_vm15, %v2611_v20, %v4759_v32  ;;  %v1204_v33 = vrot.slane %v1202_v30, 1  ;;  %v1284_v22 = vshrl.u32 %v4867_v23, 16  ;;  %v1291_v25 = vshll.u32 %v4922_v8, 16 }
  0xec   : > { %2086 = vrot.lane.b32.xlu1 %v4843_v13, %s3941_s28  ;;  %3712 = vmatprep.mubr.msk.bf16.mxu1 %vm2776_vm5, %v2741_v54  ;;  %v2302_v13 = vor.u32 %v2301_v62, %v2297_v3  ;;  %v2677_v11 = vsel %vm2657_vm1, %v2644_v36, %v4821_v57  ;;  %v1288_v26 = vrot.slane %v1286_v37, 1  ;;  %v4952_v50 = vcombine.low %v823_v29, %v4933_v10  ;;  %v4995_v36 = vld [vmem:[#allocation2 + $0x64] sm:$0xf] }
  0xed   : > { %v4924_v45 = vpop.permute.xlu0 %1313  ;;  %v4930_v60 = vpop.permute.xlu1 %1327  ;;  %v2710_v32 = vsel %vm2690_vm3, %v2677_v11, %v4871_v34  ;;  %v3476_v12 = vcombine.low %v847_v0, %v4779_v18  ;;  %v3579_v57 = vcombine.low %v983_v1, %v4826_v52  ;;  %v2429_v48 = vsel %vm1387_vm2, %v2427_v61, %v2428_v24  ;;  %v871_v0 = vld [vmem:[#allocation2 + $0x60] sm:$0xf]  ;;  %v5003_v11 = vld [vmem:[#allocation2 + $0x5c] ss:$0 sps:$4 sm:$0x11]  }
  0xee   : > { %v2307_v27 = vsel %vm1114_vm6, %v2302_v13, %v2306_v19  ;;  %v1205_v62 = vor.u32 %v1204_v33, %v1200_v17  ;;  %v1209_v46 = vrot.slane %v1207_v55, 1  ;;  %v2450_v34 = vsel %vm1387_vm2, %v2448_v51, %v2449_v44 }
  0xef   : > { %2468 = vrot.lane.b32.xlu0 %v2426_v39, %s3943_s8  ;;  %v1289_v63 = vor.u32 %v1288_v26, %v1284_v22  ;;  %v1293_v31 = vrot.slane %v1291_v25, 1  ;;  %v1298_v18 = vshll.u32 %v4952_v50, 16  ;;  %v1406_v54 = vrot.slane %v3476_v12, 1  ;;  %v856_v22 = vld [vmem:[#allocation2 + $0xb4] sm:$0xe] }
  0xf0   : > { %2356 = vrot.lane.b32.xlu1 %v2295_v14, %s3942_s7  ;;  %v1407_v2 = vrot.slane %v4836_v7, 1  ;;  %v1210_v15 = vsel %vm1114_vm6, %v1205_v62, %v1209_v46  ;;  %v2451_v41 = vrot.slane %v3579_v57, 1  ;;  %v2452_v39 = vrot.slane %v4864_v53, 1  ;;  %v4982_v7 = vld [vmem:[#allocation2 + $0x58] sm:$0xf] }
  0xf1   : > { %v4948_v40 = vpop.permute.xlu0 %1440  ;;  %v2479_v3 = vpop.permute.xlu1 %2478  ;;  %v3477_v14 = vcombine.low %v848_v5, %v4845_v47  ;;  %v1294_v30 = vsel %vm1114_vm6, %v1289_v63, %v1293_v31  ;;  %v1296_v13 = vshrl.u32 %v4952_v50, 16  ;;  %v1300_v19 = vrot.slane %v1298_v18, 1  ;;  %v885_v12 = vld [vmem:[#allocation2 + $0xb4] sm:$0xf]  ;;  %v5012_v57 = vld [vmem:[#allocation2 + $0xb8] sm:$0xf] }
  0xf2   : > { %v2743_v59 = vsel %vm2723_vm4, %v2710_v32, %v2479_v3  ;;  %v1303_v24 = vshll.u32 %v4966_v49, 16  ;;  %v1408_v53 = vsel %vm1387_vm2, %v1406_v54, %v1407_v2  ;;  %v1410_v51 = vrot.slane %v4908_v9, 1  ;;  %v887_v2 = vld [vmem:[#allocation2 + $0xc0] sm:$0xf] }
  0xf3   : > { %1319 = vrot.lane.b32.xlu0 %v1198_v35, %s3937_s24  ;;  %3713 = vmatmul.mubr.msk.bf16.vlgmr.msra.gmra.mrb[0].mxu1 %vm2776_vm5, %v2743_v59  ;;  %v1409_v47 = vrot.slane %v3477_v14, 1  ;;  %v3492_v44 = vcombine.low %v869_v58, %v4982_v7  ;;  %v2453_v20 = vsel %vm1387_vm2, %v2451_v41, %v2452_v39  ;;  %v1301_v35 = vor.u32 %v1300_v19, %v1296_v13  ;;  %v5031_v13 = vld [vmem:[#allocation2 + $0xbc] ss:$0 sps:$4 sm:$0x11]  }
  0xf4   : > { %2358 = vrot.lane.b32.xlu1 %v2307_v27, %s3942_s7  ;;  %v1305_v17 = vrot.slane %v1303_v24, 1  ;;  %v3484_v55 = vcombine.low %v855_v4, %v4851_v6  ;;  %v3493_v25 = vcombine.low %v871_v0, %v4995_v36  ;;  %v1431_v32 = vrot.slane %v4922_v8, 1  ;;  %v911_v4 = vld [vmem:[#allocation2 + $0x54] sm:$0xe] }
  0xf5   : > { %v4963_v38 = vpop.permute.xlu0 %1442  ;;  %v4969_v52 = vpop.permute.xlu1 %1329  ;;  %v1411_v9 = vsel %vm1387_vm2, %v1409_v47, %v1410_v51  ;;  %v1703_v1 = vshll.u32 %v3492_v44, 16  ;;  %v3485_v3 = vcombine.low %v856_v22, %v4933_v10  ;;  %v1701_v62 = vshrl.u32 %v3492_v44, 16 }
  0xf6   : > { %v1306_v6 = vsel %vm1114_vm6, %v1301_v35, %v1305_v17  ;;  %v1430_v26 = vrot.slane %v3484_v55, 1  ;;  %v1708_v5 = vshll.u32 %v5003_v11, 16  ;;  %v1434_v31 = vrot.slane %v4966_v49, 1  ;;  %v912_v55 = vld [vmem:[#allocation2 + $0x60] sm:$0xe] }
  0xf7   : > { %2470 = vrot.lane.b32.xlu0 %v2429_v48, %s3943_s8  ;;  %v5015_v48 = vld [vmem:[#allocation2 + $0x68] ss:$0 sps:$4 sm:$0x11]   ;;  %v1705_v46 = vrot.slane %v1703_v1, 1  ;;  %v1433_v10 = vrot.slane %v3485_v3, 1  ;;  %v3500_v18 = vcombine.low %v885_v12, %v5012_v57  ;;  %v1713_v58 = vshrl.u32 %v3493_v25, 16 }
  0xf8   : > { %2484 = vrot.lane.b32.xlu1 %v2450_v34, %s3943_s8  ;;  %v1715_v34 = vshll.u32 %v3493_v25, 16  ;;  %v1432_v8 = vsel %vm1387_vm2, %v1430_v26, %v1431_v32  ;;  %v1720_v41 = vshll.u32 %v5015_v48, 16  ;;  %v1710_v14 = vrot.slane %v1708_v5, 1  ;;  %v5046_v1 = vld [vmem:[#allocation2 + $0xc8] ss:$0 sps:$4 sm:$0x11]  }
  0xf9   : > { %v4977_v61 = vpop.permute.xlu0 %1552  ;;  %v4984_v37 = vpop.permute.xlu1 %1456  ;;  %v1706_v39 = vor.u32 %v1705_v46, %v1701_v62  ;;  %v1435_v19 = vsel %vm1387_vm2, %v1433_v10, %v1434_v31  ;;  %v3524_v35 = vcombine.low %v911_v4, %v4982_v7  ;;  %v1804_v17 = vshll.u32 %v5031_v13, 16  ;;  %v934_v32 = vld [vmem:[#allocation2 + $0x60] sm:$0xf]  ;;  %v5055_v46 = vld [vmem:[#allocation2 + $0x64] sm:$0xf] }
  0xfa   : > { %v1722_v51 = vrot.slane %v1720_v41, 1  ;;  %v1797_v22 = vshrl.u32 %v3500_v18, 16  ;;  %v1919_v12 = vrot.slane %v5003_v11, 1  ;;  %v1816_v31 = vshll.u32 %v5046_v1, 16 }
  0xfb   : > { %1321 = vrot.lane.b32.xlu0 %v1210_v15, %s3937_s24  ;;  %v5026_v15 = vld [vmem:[#allocation2 + $0xc4] sm:$0xf]  ;;  %v1918_v3 = vrot.slane %v3524_v35, 1  ;;  %v1806_v62 = vrot.slane %v1804_v17, 1  ;;  %v1943_v35 = vrot.slane %v5031_v13, 1 }
  0xfc   : > { %1335 = vrot.lane.b32.xlu1 %v1294_v30, %s3937_s24  ;;  %v1717_v30 = vrot.slane %v1715_v34, 1  ;;  %v3501_v24 = vcombine.low %v887_v2, %v5026_v15  ;;  %v919_v2 = vld [vmem:[#allocation2 + $0xb4] sm:$0xe]  ;;  %v5078_v17 = vld [vmem:[#allocation2 + $0x68] ss:$0 sps:$4 sm:$0x11]  }
  0xfd   : > { %v4991_v29 = vpop.permute.xlu0 %1554  ;;  %v4997_v33 = vpop.permute.xlu1 %1458  ;;  %v1920_v11 = vsel %vm1387_vm2, %v1918_v3, %v1919_v12  ;;  %v2498_v3 = vsel %vm2492_vm11, %v4262_v21, %v4861_v56  ;;  %v5090_v12 = vld [vmem:[#allocation2 + $0x74] ss:$0 sps:$4 sm:$0x11]  }
  0xff   : > { %1448 = vrot.lane.b32.xlu0 %v1408_v53, %s3936_s23  ;;  %v1799_v53 = vshll.u32 %v3500_v18, 16 }
 0x100   : > { %2486 = vrot.lane.b32.xlu1 %v2453_v20, %s3943_s8  ;;  %v1718_v20 = vor.u32 %v1717_v30, %v1713_v58  ;;  %v936_v58 = vld [vmem:[#allocation2 + $0x6c] sm:$0xf]  ;;  %v5066_v30 = vld [vmem:[#allocation2 + $0x70] sm:$0xf] }
 0x101   : > { %v5005_v27 = vpop.permute.xlu0 %1824  ;;  %v5010_v59 = vpop.permute.xlu1 %1568 }
 0x102   : > { %v1723_v7 = vsel %vm1114_vm6, %v1718_v20, %v1722_v51  ;;  %v1818_v51 = vrot.slane %v1816_v31, 1  ;;  %v920_v20 = vld [vmem:[#allocation2 + $0xc0] sm:$0xe] }
 0x103   : > { %1450 = vrot.lane.b32.xlu0 %v1411_v9, %s3936_s23  ;;  %v1801_v9 = vrot.slane %v1799_v53, 1 }
 0x104   : > { %1337 = vrot.lane.b32.xlu1 %v1306_v6, %s3937_s24  ;;  %v1811_v6 = vshll.u32 %v3501_v24, 16 }
 0x105   : > { %v5019_v63 = vpop.permute.xlu0 %1826  ;;  %v5024_v54 = vpop.permute.xlu1 %1570  ;;  %v1802_v34 = vor.u32 %v1801_v9, %v1797_v22 }
 0x106   : > { %v1813_v10 = vrot.slane %v1811_v6, 1  ;;  %v3533_v6 = vcombine.low %v920_v20, %v5026_v15 }
 0x107   : > { %1560 = vrot.lane.b32.xlu0 %v3492_v44, %s3938_s25  ;;  %v1711_v44 = vsel %vm1114_vm6, %v1706_v39, %v1710_v14  ;;  %v1922_v39 = vrot.slane %v5015_v48, 1  ;;  %v3532_v14 = vcombine.low %v919_v2, %v5012_v57  ;;  %v1807_v4 = vsel %vm1114_vm6, %v1802_v34, %v1806_v62 }
 0x108   : > { %1464 = vrot.lane.b32.xlu1 %v1432_v8, %s3936_s23  ;;  %v1809_v8 = vshrl.u32 %v3501_v24, 16  ;;  %v2531_v34 = vsel %vm2525_vm12, %v2498_v3, %v4948_v40  ;;  %v1945_v56 = vrot.slane %v3533_v6, 1  ;;  %v1946_v2 = vrot.slane %v5046_v1, 1  ;;  %v976_v1 = vld [vmem:[#allocation2 + $0x60] sm:$0xe] }
 0x109   : > { %v5033_v49 = vpop.permute.xlu0 %1952  ;;  %v5037_v47 = vpop.permute.xlu1 %1840  ;;  %v1942_v48 = vrot.slane %v3532_v14, 1  ;;  %v2564_v31 = vsel %vm2558_vm13, %v2531_v34, %v4977_v61  ;;  %v3572_v3 = vcombine.low %v976_v1, %v5055_v46 }
 0x10a   : > { %v1814_v53 = vor.u32 %v1813_v10, %v1809_v8  ;;  %v2220_v10 = vshll.u32 %v5078_v17, 16  ;;  %v2597_v40 = vsel %vm2591_vm14, %v2564_v31, %v5005_v27 }
 0x10b   : > { %1562 = vrot.lane.b32.xlu0 %v3493_v25, %s3938_s25  ;;  %v3525_v25 = vcombine.low %v912_v55, %v4995_v36  ;;  %v3540_v36 = vcombine.low %v934_v32, %v5055_v46  ;;  %v950_v32 = vld [vmem:[#allocation2 + $0xc0] sm:$0xf]  ;;  %v1944_v15 = vsel %vm1387_vm2, %v1942_v48, %v1943_v35  ;;  %v5118_v48 = vld [vmem:[#allocation2 + $0xc8] ss:$0 sps:$4 sm:$0x11]  }
 0x10c   : > { %1466 = vrot.lane.b32.xlu1 %v1435_v19, %s3936_s23  ;;  %v1819_v9 = vsel %vm1114_vm6, %v1814_v53, %v1818_v51  ;;  %v2232_v53 = vshll.u32 %v5090_v12, 16  ;;  %v977_v35 = vld [vmem:[#allocation2 + $0x6c] sm:$0xe] }
 0x10d   : > { %v5044_v0 = vpop.permute.xlu0 %1954  ;;  %v5048_v26 = vpop.permute.xlu1 %1842  ;;  %v2215_v55 = vshll.u32 %v3540_v36, 16  ;;  %v2213_v13 = vshrl.u32 %v3540_v36, 16 }
 0x10f   : > { %1832 = vrot.lane.b32.xlu0 %v1711_v44, %s3939_s26  ;;  %v2217_v8 = vrot.slane %v2215_v55, 1 }
 0x110   : > { %1576 = vrot.lane.b32.xlu1 %v3500_v18, %s3938_s25  ;;  %v1921_v18 = vrot.slane %v3525_v25, 1 }
 0x111   : > { %v2065_v5 = vpop.permute.xlu0 %2064  ;;  %v5058_v41 = vpop.permute.xlu1 %1968  ;;  %v2218_v20 = vor.u32 %v2217_v8, %v2213_v13  ;;  %v2514_v13 = vsel %vm2492_vm11, %v4306_v28, %v4930_v60  ;;  %v5138_v8 = vld [vmem:[#allocation2 + $0xd4] ss:$0 sps:$4 sm:$0x11]  }
 0x112   : > { %v1923_v57 = vsel %vm1387_vm2, %v1921_v18, %v1922_v39  ;;  %v952_v18 = vld [vmem:[#allocation2 + $0xcc] sm:$0xf]  ;;  %v5103_v39 = vld [vmem:[#allocation2 + $0xd0] sm:$0xf]  ;;  %v2547_v28 = vsel %vm2525_vm12, %v2514_v13, %v4984_v37 }
 0x113   : > { %1834 = vrot.lane.b32.xlu0 %v1723_v7, %s3939_s26  ;;  %v5084_v7 = vld [vmem:[#allocation2 + $0xc4] sm:$0xf]  ;;  %v5116_v27 = vcombine.low %v952_v18, %v5103_v39  ;;  %v2431_v18 = vrot.slane %v5078_v17, 1 }
 0x114   : > { %1578 = vrot.lane.b32.xlu1 %v3501_v24, %s3938_s25  ;;  %v3541_v24 = vcombine.low %v936_v58, %v5066_v30  ;;  %v2630_v58 = vsel %vm2624_vm15, %v2597_v40, %v5033_v49  ;;  %v2500_v49 = vsel %vm2492_vm11, %v4303_v16, %v4924_v45  ;;  %v2234_v45 = vrot.slane %v2232_v53, 1 }
 0x115   : > { %v5068_v19 = vpop.permute.xlu0 %2066  ;;  %v5071_v44 = vpop.permute.xlu1 %1970  ;;  %v2663_v51 = vsel %vm2657_vm1, %v2630_v58, %v2065_v5  ;;  %v2321_v58 = vshrl.u32 %v5116_v27, 16 }
 0x116   : > { %v2227_v62 = vshll.u32 %v3541_v24, 16  ;;  %v2225_v61 = vshrl.u32 %v3541_v24, 16 }
 0x117   : > { %1960 = vrot.lane.b32.xlu0 %v1920_v11, %s3940_s27  ;;  %v3548_v11 = vcombine.low %v950_v32, %v5084_v7 }
 0x118   : > { %1848 = vrot.lane.b32.xlu1 %v1807_v4, %s3939_s26  ;;  %v2229_v4 = vrot.slane %v2227_v62, 1  ;;  %v2533_v62 = vsel %vm2525_vm12, %v2500_v49, %v4963_v38  ;;  %v2323_v38 = vshll.u32 %v5116_v27, 16  ;;  %v2434_v49 = vrot.slane %v5090_v12, 1 }
 0x119   : > { %v2337_v22 = vpop.permute.xlu0 %2336  ;;  %v5082_v25 = vpop.permute.xlu1 %2080  ;;  %v2311_v5 = vshll.u32 %v3548_v11, 16  ;;  %v2309_v46 = vshrl.u32 %v3548_v11, 16  ;;  %v2566_v60 = vsel %vm2558_vm13, %v2533_v62, %v4991_v29 }
 0x11a   : > { %v2230_v16 = vor.u32 %v2229_v4, %v2225_v61  ;;  %v2599_v31 = vsel %vm2591_vm14, %v2566_v60, %v5019_v63  ;;  %v2325_v1 = vrot.slane %v2323_v38, 1 }
 0x11b   : > { %1962 = vrot.lane.b32.xlu0 %v1923_v57, %s3940_s27  ;;  %v2222_v57 = vrot.slane %v2220_v10, 1  ;;  %v2580_v10 = vsel %vm2558_vm13, %v2547_v28, %v5010_v59  ;;  %v2632_v29 = vsel %vm2624_vm15, %v2599_v31, %v5044_v0 }
 0x11c   : > { %1850 = vrot.lane.b32.xlu1 %v1819_v9, %s3939_s26  ;;  %v1947_v9 = vsel %vm1387_vm2, %v1945_v56, %v1946_v2  ;;  %v2430_v2 = vrot.slane %v3572_v3, 1  ;;  %v2613_v37 = vsel %vm2591_vm14, %v2580_v10, %v5037_v47  ;;  %v2235_v40 = vsel %vm1114_vm6, %v2230_v16, %v2234_v45  ;;  %v985_v3 = vld [vmem:[#allocation2 + $0xcc] sm:$0xe] }
 0x11d   : > { %v5099_v21 = vpop.permute.xlu0 %2338  ;;  %v5107_v14 = vpop.permute.xlu1 %2082  ;;  %v2223_v34 = vsel %vm1114_vm6, %v2218_v20, %v2222_v57  ;;  %v2646_v59 = vsel %vm2624_vm15, %v2613_v37, %v5058_v41  ;;  %v2665_v63 = vsel %vm2657_vm1, %v2632_v29, %v5068_v19  ;;  %v2328_v47 = vshll.u32 %v5138_v8, 16  ;;  %v984_v19 = vld [vmem:[#allocation2 + $0xc0] sm:$0xe]  ;;  %v5468_v57 = vld [vmem:[#allocation3_spill] sm:$0xff] }
 0x11e   : > { %v2679_v0 = vsel %vm2657_vm1, %v2646_v59, %v5082_v25  ;;  %v2698_v61 = vsel %vm2690_vm3, %v2665_v63, %v5099_v21  ;;  %v2432_v25 = vsel %vm1387_vm2, %v2430_v2, %v2431_v18  ;;  %v2516_v21 = vsel %vm2492_vm11, %v5468_v57, %v4969_v52 }
 0x11f   : > { %2072 = vrot.lane.b32.xlu0 %v3540_v36, %s3941_s28  ;;  %v2696_v36 = vsel %vm2690_vm3, %v2663_v51, %v2337_v22  ;;  %v3573_v22 = vcombine.low %v977_v35, %v5066_v30  ;;  %v2313_v30 = vrot.slane %v2311_v5, 1  ;;  %v3581_v16 = vcombine.low %v985_v3, %v5103_v39 }
 0x120   : > { %1976 = vrot.lane.b32.xlu1 %v1944_v15, %s3940_s27  ;;  %v2316_v15 = vshll.u32 %v5118_v48, 16 }
 0x121   : > { %v2465_v55 = vpop.permute.xlu0 %2464  ;;  %v2353_v32 = vpop.permute.xlu1 %2352  ;;  %v2314_v53 = vor.u32 %v2313_v30, %v2309_v46  ;;  %v2433_v35 = vrot.slane %v3573_v22, 1  ;;  %v2457_v46 = vrot.slane %v3581_v16, 1 }
 0x122   : > { %v2729_v6 = vsel %vm2723_vm4, %v2696_v36, %v2465_v55  ;;  %v2318_v17 = vrot.slane %v2316_v15, 1  ;;  %v2712_v51 = vsel %vm2690_vm3, %v2679_v0, %v2353_v32  ;;  %v2330_v36 = vrot.slane %v2328_v47, 1 }
 0x123   : > { %2074 = vrot.lane.b32.xlu0 %v3541_v24, %s3941_s28  ;;  %3700 = vmatprep.mubr.msk.bf16.mxu0 %vm2776_vm5, %v2729_v6  ;;  %v2549_v55 = vsel %vm2525_vm12, %v2516_v21, %v4997_v33  ;;  %v2326_v6 = vor.u32 %v2325_v1, %v2321_v58  ;;  %v3580_v32 = vcombine.low %v984_v19, %v5084_v7  ;;  %v2458_v15 = vrot.slane %v5138_v8, 1 }
 0x124   : > { %1978 = vrot.lane.b32.xlu1 %v1947_v9, %s3940_s27  ;;  %v2319_v5 = vsel %vm1114_vm6, %v2314_v53, %v2318_v17  ;;  %v2582_v52 = vsel %vm2558_vm13, %v2549_v55, %v5024_v54  ;;  %v2435_v33 = vsel %vm1387_vm2, %v2433_v35, %v2434_v49 }
 0x125   : > { %v5144_v24 = vpop.permute.xlu0 %1315  ;;  %v2355_v56 = vpop.permute.xlu1 %2354  ;;  %v2615_v13 = vsel %vm2591_vm14, %v2582_v52, %v5048_v26  ;;  %v2331_v54 = vsel %vm1114_vm6, %v2326_v6, %v2330_v36  ;;  %v2454_v22 = vrot.slane %v3580_v32, 1  ;;  %v2455_v26 = vrot.slane %v5118_v48, 1  ;;  %v5471_v36 = vld [vmem:[#allocation5_spill] sm:$0xff] }
 0x126   : > { %v2648_v12 = vsel %vm2624_vm15, %v2615_v13, %v5071_v44  ;;  %v2459_v60 = vsel %vm1387_vm2, %v2457_v46, %v2458_v15  ;;  %vm3276_vm6 = vcmask 60416  }
 0x127   : > { %2344 = vrot.lane.b32.xlu0 %v2223_v34, %s3942_s7  ;;  %v2681_v7 = vsel %vm2657_vm1, %v2648_v12, %v5107_v14  ;;  %v2456_v14 = vsel %vm1387_vm2, %v2454_v22, %v2455_v26 }
 0x128   : > { %2088 = vrot.lane.b32.xlu1 %v3548_v11, %s3941_s28  ;;  %v2714_v62 = vsel %vm2690_vm3, %v2681_v7, %v2355_v56 }
 0x129   : > { %v2467_v4 = vpop.permute.xlu0 %2466  ;;  %v2481_v20 = vpop.permute.xlu1 %2480 }
 0x12a   : > { %v2731_v41 = vsel %vm2723_vm4, %v2698_v61, %v2467_v4  ;;  %v2745_v11 = vsel %vm2723_vm4, %v2712_v51, %v2481_v20  ;;  %v5469_v61 = vld [vmem:[#allocation4_spill] sm:$0xff] }
 0x12b   : > { %2346 = vrot.lane.b32.xlu0 %v2235_v40, %s3942_s7  ;;  %3701 = vmatmul.mubr.msk.bf16.gmra.mrb[4].mxu0 %vm2776_vm5, %v2731_v41  ;;  %v2502_v4 = vsel %vm2492_vm11, %v5469_v61, %v5144_v24 }
 0x12c   : > { %2090 = vrot.lane.b32.xlu1 %v5116_v27, %s3941_s28  ;;  %3716 = vmatprep.mubr.msk.bf16.mxu1 %vm2776_vm5, %v2745_v11 }
 0x12d   : > { %v1318_v9 = vpop.permute.xlu0 %1317  ;;  %v1332_v27 = vpop.permute.xlu1 %1331 }
 0x12e   : > { %v2518_v55 = vsel %vm2492_vm11, %v5471_v36, %v1332_v27 }
 0x12f   : > { %2472 = vrot.lane.b32.xlu0 %v2432_v25, %s3943_s8  ;;  %v5470_v25 = vld [vmem:[#allocation6_spill] sm:$0xff] }
 0x130   : > { %2360 = vrot.lane.b32.xlu1 %v2319_v5, %s3942_s7  ;;  %v2504_v57 = vsel %vm2492_vm11, %v5470_v25, %v1318_v9 }
 0x131   : > { %v1445_v45 = vpop.permute.xlu0 %1444  ;;  %v2483_v34 = vpop.permute.xlu1 %2482 }
 0x132   : > { %v2747_v44 = vsel %vm2723_vm4, %v2714_v62, %v2483_v34  ;;  %v2535_v53 = vsel %vm2525_vm12, %v2502_v4, %v1445_v45 }
 0x133   : > { %2474 = vrot.lane.b32.xlu0 %v2435_v33, %s3943_s8  ;;  %3717 = vmatmul.mubr.msk.bf16.gmra.mrb[4].mxu1 %vm2776_vm5, %v2747_v44  ;;  %v5472_v44 = vld [vmem:[#allocation7_spill] sm:$0xff] }
 0x134   : > { %2362 = vrot.lane.b32.xlu1 %v2331_v54, %s3942_s7 }
 0x135   : > { %v1447_v39 = vpop.permute.xlu0 %1446  ;;  %v1334_v28 = vpop.permute.xlu1 %1333 }
 0x136   : > { %v2537_v5 = vsel %vm2525_vm12, %v2504_v57, %v1447_v39  ;;  %v2520_v39 = vsel %vm2492_vm11, %v5472_v44, %v1334_v28 }
 0x138   : > { %2488 = vrot.lane.b32.xlu1 %v2456_v14, %s3943_s8 }
 0x139   : > { %v1557_v48 = vpop.permute.xlu0 %1556  ;;  %v1461_v30 = vpop.permute.xlu1 %1460 }
 0x13a   : > { %v2568_v1 = vsel %vm2558_vm13, %v2535_v53, %v1557_v48  ;;  %v2551_v6 = vsel %vm2525_vm12, %v2518_v55, %v1461_v30 }
 0x13c   : > { %2490 = vrot.lane.b32.xlu1 %v2459_v60, %s3943_s8 }
 0x13d   : > { %v1559_v38 = vpop.permute.xlu0 %1558  ;;  %v1463_v10 = vpop.permute.xlu1 %1462 }
 0x13e   : > { %v2570_v32 = vsel %vm2558_vm13, %v2537_v5, %v1559_v38  ;;  %v2553_v14 = vsel %vm2525_vm12, %v2520_v39, %v1463_v10 }
 0x141   : > { %v1829_v31 = vpop.permute.xlu0 %1828  ;;  %v1573_v56 = vpop.permute.xlu1 %1572 }
 0x142   : > { %v2601_v41 = vsel %vm2591_vm14, %v2568_v1, %v1829_v31  ;;  %v2584_v9 = vsel %vm2558_vm13, %v2551_v6, %v1573_v56 }
 0x145   : > { %v1831_v2 = vpop.permute.xlu0 %1830  ;;  %v1575_v18 = vpop.permute.xlu1 %1574 }
 0x146   : > { %v2603_v52 = vsel %vm2591_vm14, %v2570_v32, %v1831_v2  ;;  %v2586_v15 = vsel %vm2558_vm13, %v2553_v14, %v1575_v18 }
 0x149   : > { %v1957_v37 = vpop.permute.xlu0 %1956  ;;  %v1845_v29 = vpop.permute.xlu1 %1844 }
 0x14a   : > { %v2634_v19 = vsel %vm2624_vm15, %v2601_v41, %v1957_v37  ;;  %v2617_v12 = vsel %vm2591_vm14, %v2584_v9, %v1845_v29 }
 0x14d   : > { %v1959_v40 = vpop.permute.xlu0 %1958  ;;  %v1847_v58 = vpop.permute.xlu1 %1846 }
 0x14e   : > { %v2636_v33 = vsel %vm2624_vm15, %v2603_v52, %v1959_v40  ;;  %v2619_v60 = vsel %vm2591_vm14, %v2586_v15, %v1847_v58 }
 0x151   : > { %v2069_v8 = vpop.permute.xlu0 %2068  ;;  %v1973_v59 = vpop.permute.xlu1 %1972 }
 0x152   : > { %v2667_v11 = vsel %vm2657_vm1, %v2634_v19, %v2069_v8  ;;  %v2650_v16 = vsel %vm2624_vm15, %v2617_v12, %v1973_v59 }
 0x155   : > { %v2071_v63 = vpop.permute.xlu0 %2070 }
 0x156   : > { %v1975_v17 = vpop.permute.xlu1 %1974  ;;  %v2669_v27 = vsel %vm2657_vm1, %v2636_v33, %v2071_v63 }
 0x157   : > { %v2652_v30 = vsel %vm2624_vm15, %v2619_v60, %v1975_v17 }
 0x159   : > { %v2341_v47 = vpop.permute.xlu0 %2340 }
 0x15a   : > { %v2085_v0 = vpop.permute.xlu1 %2084  ;;  %v2700_v21 = vsel %vm2690_vm3, %v2667_v11, %v2341_v47 }
 0x15b   : > { %v2683_v7 = vsel %vm2657_vm1, %v2650_v16, %v2085_v0 }
 0x15d   : > { %v2343_v51 = vpop.permute.xlu0 %2342 }
 0x15e   : > { %v2087_v20 = vpop.permute.xlu1 %2086  ;;  %v2702_v45 = vsel %vm2690_vm3, %v2669_v27, %v2343_v51 }
 0x15f   : > { %v2685_v38 = vsel %vm2657_vm1, %v2652_v30, %v2087_v20 }
 0x161   : > { %v2469_v35 = vpop.permute.xlu0 %2468 }
 0x162   : > { %v2733_v24 = vsel %vm2723_vm4, %v2700_v21, %v2469_v35  ;;  %v2357_v49 = vpop.permute.xlu1 %2356 }
 0x163   : > { %3704 = vmatprep.mubr.msk.bf16.mxu0 %vm2776_vm5, %v2733_v24  ;;  %v2716_v22 = vsel %vm2690_vm3, %v2683_v7, %v2357_v49 }
 0x165   : > { %v1320_v3 = vpop.permute.xlu0 %1319 }
 0x166   : > { %v2359_v13 = vpop.permute.xlu1 %2358  ;;  %v2506_v11 = vsel %vm2492_vm11, %v4805_v42, %v1320_v3 }
 0x167   : > { %v2718_v56 = vsel %vm2690_vm3, %v2685_v38, %v2359_v13 }
 0x169   : > { %v2471_v54 = vpop.permute.xlu0 %2470 }
 0x16a   : > { %v2735_v26 = vsel %vm2723_vm4, %v2702_v45, %v2471_v54  ;;  %v2485_v62 = vpop.permute.xlu1 %2484 }
 0x16b   : > { %v2749_v34 = vsel %vm2723_vm4, %v2716_v22, %v2485_v62  ;;  %3705 = vmatmul.mubr.msk.bf16.gmra.mrb[8].mxu0 %vm2776_vm5, %v2735_v26 }
 0x16c   : > { %3720 = vmatprep.mubr.msk.bf16.mxu1 %vm2776_vm5, %v2749_v34 }
 0x16d   : > { %v1322_v46 = vpop.permute.xlu0 %1321 }
 0x16e   : > { %v1336_v48 = vpop.permute.xlu1 %1335  ;;  %v2508_v57 = vsel %vm2492_vm11, %v4859_v43, %v1322_v46 }
 0x16f   : > { %v2522_v13 = vsel %vm2492_vm11, %v4867_v23, %v1336_v48 }
 0x171   : > { %v1449_v31 = vpop.permute.xlu0 %1448 }
 0x172   : > { %v2487_v2 = vpop.permute.xlu1 %2486  ;;  %v2539_v25 = vsel %vm2525_vm12, %v2506_v11, %v1449_v31  ;;  %v5294_v31 = vld [vmem:[%s5447_s2] ss:$0 sm:$0xff] }
 0x173   : > { %v2751_v28 = vsel %vm2723_vm4, %v2718_v56, %v2487_v2  ;;  %v5299_v2 = vld [vmem:[%s5448_s3] ss:$0 sm:$0xff] }
 0x174   : > { %3721 = vmatmul.mubr.msk.bf16.gmra.mrb[8].mxu1 %vm2776_vm5, %v2751_v28 }
 0x175   : > { %v1451_v37 = vpop.permute.xlu0 %1450 }
 0x176   : > { %v1338_v10 = vpop.permute.xlu1 %1337  ;;  %v2541_v55 = vsel %vm2525_vm12, %v2508_v57, %v1451_v37 }
 0x177   : > { %v2524_v26 = vsel %vm2492_vm11, %v4952_v50, %v1338_v10 }
 0x179   : > { %v1561_v29 = vpop.permute.xlu0 %1560 }
 0x17a   : > { %v1465_v40 = vpop.permute.xlu1 %1464  ;;  %v2572_v21 = vsel %vm2558_vm13, %v2539_v25, %v1561_v29 }
 0x17b   : > { %v2555_v33 = vsel %vm2525_vm12, %v2522_v13, %v1465_v40 }
 0x17d   : > { %v1563_v18 = vpop.permute.xlu0 %1562 }
 0x17e   : > { %v1467_v8 = vpop.permute.xlu1 %1466  ;;  %v2574_v6 = vsel %vm2558_vm13, %v2541_v55, %v1563_v18 }
 0x17f   : > { %v2557_v62 = vsel %vm2525_vm12, %v2524_v26, %v1467_v8 }
 0x181   : > { %v1833_v59 = vpop.permute.xlu0 %1832 }
 0x182   : > { %v1577_v58 = vpop.permute.xlu1 %1576  ;;  %v2605_v24 = vsel %vm2591_vm14, %v2572_v21, %v1833_v59 }
 0x183   : > { %v2588_v7 = vsel %vm2558_vm13, %v2555_v33, %v1577_v58 }
 0x185   : > { %v1835_v63 = vpop.permute.xlu0 %1834 }
 0x186   : > { %v1579_v17 = vpop.permute.xlu1 %1578  ;;  %v2607_v3 = vsel %vm2591_vm14, %v2574_v6, %v1835_v63 }
 0x187   : > { %v2590_v44 = vsel %vm2558_vm13, %v2557_v62, %v1579_v17 }
 0x189   : > { %v1961_v47 = vpop.permute.xlu0 %1960 }
 0x18a   : > { %v1849_v0 = vpop.permute.xlu1 %1848  ;;  %v2638_v36 = vsel %vm2624_vm15, %v2605_v24, %v1961_v47 }
 0x18b   : > { %v2621_v22 = vsel %vm2591_vm14, %v2588_v7, %v1849_v0 }
 0x18d   : > { %v1963_v61 = vpop.permute.xlu0 %1962 }
 0x18e   : > { %v1851_v4 = vpop.permute.xlu1 %1850  ;;  %v2640_v52 = vsel %vm2624_vm15, %v2607_v3, %v1963_v61 }
 0x18f   : > { %v2623_v46 = vsel %vm2591_vm14, %v2590_v44, %v1851_v4 }
 0x191   : > { %v2073_v53 = vpop.permute.xlu0 %2072 }
 0x192   : > { %v1977_v1 = vpop.permute.xlu1 %1976  ;;  %v2671_v5 = vsel %vm2657_vm1, %v2638_v36, %v2073_v53 }
 0x193   : > { %v2654_v23 = vsel %vm2624_vm15, %v2621_v22, %v1977_v1 }
 0x195   : > { %v2075_v51 = vpop.permute.xlu0 %2074 }
 0x196   : > { %v1979_v41 = vpop.permute.xlu1 %1978  ;;  %v2673_v12 = vsel %vm2657_vm1, %v2640_v52, %v2075_v51 }
 0x197   : > { %v2656_v48 = vsel %vm2624_vm15, %v2623_v46, %v1979_v41 }
 0x199   : > { %v2345_v20 = vpop.permute.xlu0 %2344 }
 0x19a   : > { %v2089_v19 = vpop.permute.xlu1 %2088  ;;  %v2704_v42 = vsel %vm2690_vm3, %v2671_v5, %v2345_v20 }
 0x19b   : > { %v2687_v34 = vsel %vm2657_vm1, %v2654_v23, %v2089_v19 }
 0x19d   : > { %v2347_v35 = vpop.permute.xlu0 %2346 }
 0x19e   : > { %v2091_v49 = vpop.permute.xlu1 %2090  ;;  %v2706_v16 = vsel %vm2690_vm3, %v2673_v12, %v2347_v35 }
 0x19f   : > { %v2689_v50 = vsel %vm2657_vm1, %v2656_v48, %v2091_v49 }
 0x1a1   : > { %v2473_v32 = vpop.permute.xlu0 %2472 }
 0x1a2   : > { %v2737_v43 = vsel %vm2723_vm4, %v2704_v42, %v2473_v32  ;;  %v2361_v9 = vpop.permute.xlu1 %2360 }
 0x1a3   : > { %3708 = vmatprep.mubr.msk.bf16.mxu0 %vm2776_vm5, %v2737_v43  ;;  %v2720_v39 = vsel %vm2690_vm3, %v2687_v34, %v2361_v9 }
 0x1a5   : > { %v2475_v27 = vpop.permute.xlu0 %2474 }
 0x1a6   : > { %v2739_v45 = vsel %vm2723_vm4, %v2706_v16, %v2475_v27  ;;  %v2363_v54 = vpop.permute.xlu1 %2362 }
 0x1a7   : > { %3709 = vmatmul.mubr.msk.bf16.gmra.mrb[12].mxu0 %vm2776_vm5, %v2739_v45  ;;  %v2722_v60 = vsel %vm2690_vm3, %v2689_v50, %v2363_v54 }
 0x1aa   : > { %v2489_v14 = vpop.permute.xlu1 %2488 }
 0x1ab   : > { %v2753_v15 = vsel %vm2723_vm4, %v2720_v39, %v2489_v14 }
 0x1ac   : > { %3724 = vmatprep.mubr.msk.bf16.mxu1 %vm2776_vm5, %v2753_v15 }
 0x1ae   : > { %v2491_v30 = vpop.permute.xlu1 %2490 }
 0x1af   : > { %v2755_v38 = vsel %vm2723_vm4, %v2722_v60, %v2491_v30 }
 0x1b0   : > { %3725 = vmatmul.mubr.msk.bf16.gmra.mrb[12].mxu1 %vm2776_vm5, %v2755_v38 }
 0x1be   : > { %v3698_v56 = vpop.f32.mrb[0].mxu0 }
 0x1bf   : > { %v2983_v28 = vmul.f32 %v3698_v56, %v5294_v31  ;;  %v2847_v37 = vpop.f32.mrb[1].mxu0 }
 0x1c0   : > { %v2981_v10 = vmul.f32 %v5294_v31, %v2847_v37  ;;  %v3699_v29 = vpop.f32.mrb[2].mxu0 }
 0x1c1   : > { %v3022_v40 = vadd.f32 %v5299_v2, %v2983_v28  ;;  %v2984_v18 = vmul.f32 %v3699_v29, %v5294_v31  ;;  %v2850_v8 = vpop.f32.mrb[3].mxu0 }
 0x1c2   : > { %v3020_v59 = vadd.f32 %v5299_v2, %v2981_v10  ;;  %v2982_v58 = vmul.f32 %v5294_v31, %v2850_v8 }
 0x1c3   : > { %vm3054_vm0 = vcmp.gt.f32.partialorder %v3022_v40, 0.0  ;;  %v3086_v63 = vmul.f32 0.1, %v3022_v40  ;;  %v3023_v17 = vadd.f32 %v5299_v2, %v2984_v18 }
 0x1c4   : > { %vm3052_vm2 = vcmp.gt.f32.partialorder %v3020_v59, 0.0  ;;  %v3084_v47 = vmul.f32 0.1, %v3020_v59  ;;  %v3021_v0 = vadd.f32 %v5299_v2, %v2982_v58 }
 0x1c5   : > { %v3118_v61 = vsel %vm3054_vm0, %v3022_v40, %v3086_v63  ;;  %vm3055_vm7 = vcmp.gt.f32.partialorder %v3023_v17, 0.0  ;;  %v3087_v4 = vmul.f32 0.1, %v3023_v17 }
 0x1c6   : > { %v3641_v53 = vpack.c.bf16 %v3118_v61, %v3118_v61  ;;  %v3116_v1 = vsel %vm3052_vm2, %v3020_v59, %v3084_v47  ;;  %vm3053_vm8 = vcmp.gt.f32.partialorder %v3021_v0, 0.0  ;;  %v3085_v51 = vmul.f32 0.1, %v3021_v0  ;;  %v3714_v19 = vpop.f32.mrb[0].mxu1 }
 0x1c7   : > { %v3639_v41 = vpack.c.bf16 %v3116_v1, %v3116_v1  ;;  %v3119_v20 = vsel %vm3055_vm7, %v3023_v17, %v3087_v4  ;;  %v2999_v57 = vmul.f32 %v3714_v19, %v5294_v31  ;;  %v2911_v21 = vpop.f32.mrb[1].mxu1 }
 0x1c8   : > { %3279 = vst.msk [vmem:[%s5314_s22 + $0x8] sm:$0xf] %vm3276_vm6, %v3641_v53  ;;  %v3642_v11 = vpack.c.bf16 %v3119_v20, %v3119_v20  ;;  %v3117_v25 = vsel %vm3053_vm8, %v3021_v0, %v3085_v51  ;;  %v2997_v24 = vmul.f32 %v5294_v31, %v2911_v21  ;;  %v3715_v49 = vpop.f32.mrb[2].mxu1 }
 0x1c9   : > { %3277 = vst.msk [vmem:[%s5314_s22] sm:$0xf] %vm3276_vm6, %v3639_v41  ;;  %v3640_v35 = vpack.c.bf16 %v3117_v25, %v3117_v25  ;;  %v3038_v36 = vadd.f32 %v5299_v2, %v2999_v57  ;;  %v3000_v55 = vmul.f32 %v3715_v49, %v5294_v31  ;;  %v2914_v5 = vpop.f32.mrb[3].mxu1 }
 0x1ca   : > { %3280 = vst.msk [vmem:[%s5314_s22 + $0xc] sm:$0xf] %vm3276_vm6, %v3642_v11  ;;  %v3036_v6 = vadd.f32 %v5299_v2, %v2997_v24  ;;  %v2998_v42 = vmul.f32 %v5294_v31, %v2914_v5 }
 0x1cb   : > { %3278 = vst.msk [vmem:[%s5314_s22 + $0x4] sm:$0xf] %vm3276_vm6, %v3640_v35  ;;  %vm3070_vm9 = vcmp.gt.f32.partialorder %v3038_v36, 0.0  ;;  %v3102_v32 = vmul.f32 0.1, %v3038_v36  ;;  %v3039_v3 = vadd.f32 %v5299_v2, %v3000_v55 }
 0x1cc   : > { %vm3068_vm10 = vcmp.gt.f32.partialorder %v3036_v6, 0.0  ;;  %v3100_v43 = vmul.f32 0.1, %v3036_v6  ;;  %v3037_v9 = vadd.f32 %v5299_v2, %v2998_v42 }
 0x1cd   : > { %v3134_v52 = vsel %vm3070_vm9, %v3038_v36, %v3102_v32  ;;  %vm3071_vm11 = vcmp.gt.f32.partialorder %v3039_v3, 0.0  ;;  %v3103_v13 = vmul.f32 0.1, %v3039_v3 }
 0x1ce   : > { %v3657_v12 = vpack.c.bf16 %v3134_v52, %v3134_v52  ;;  %v3132_v33 = vsel %vm3068_vm10, %v3036_v6, %v3100_v43  ;;  %vm3069_vm12 = vcmp.gt.f32.partialorder %v3037_v9, 0.0  ;;  %v3101_v16 = vmul.f32 0.1, %v3037_v9 }
 0x1cf   : > { %v3655_v27 = vpack.c.bf16 %v3132_v33, %v3132_v33  ;;  %v3135_v7 = vsel %vm3071_vm11, %v3039_v3, %v3103_v13 }
 0x1d0   : > { %3295 = vst.msk [vmem:[%s5314_s22 + $0x48] sm:$0xf] %vm3276_vm6, %v3657_v12  ;;  %v3658_v45 = vpack.c.bf16 %v3135_v7, %v3135_v7  ;;  %v3133_v54 = vsel %vm3069_vm12, %v3037_v9, %v3101_v16 }
 0x1d1   : > { %3293 = vst.msk [vmem:[%s5314_s22 + $0x40] sm:$0xf] %vm3276_vm6, %v3655_v27  ;;  %v3656_v22 = vpack.c.bf16 %v3133_v54, %v3133_v54 }
 0x1d2   : > { %3296 = vst.msk [vmem:[%s5314_s22 + $0x4c] sm:$0xf] %vm3276_vm6, %v3658_v45 }
 0x1d3   : > { %3294 = vst.msk [vmem:[%s5314_s22 + $0x44] sm:$0xf] %vm3276_vm6, %v3656_v22 }
 0x1fe   : > { %v3702_v26 = vpop.f32.mrb[4].mxu0 }
 0x1ff   : > { %v2987_v23 = vmul.f32 %v3702_v26, %v5294_v31  ;;  %v2863_v62 = vpop.f32.mrb[5].mxu0 }
 0x200   : > { %v2985_v34 = vmul.f32 %v5294_v31, %v2863_v62  ;;  %v3703_v44 = vpop.f32.mrb[6].mxu0 }
 0x201   : > { %v3026_v39 = vadd.f32 %v5299_v2, %v2987_v23  ;;  %v2988_v14 = vmul.f32 %v3703_v44, %v5294_v31  ;;  %v2866_v46 = vpop.f32.mrb[7].mxu0 }
 0x202   : > { %v3024_v15 = vadd.f32 %v5299_v2, %v2985_v34  ;;  %v2986_v48 = vmul.f32 %v5294_v31, %v2866_v46 }
 0x203   : > { %vm3058_vm13 = vcmp.gt.f32.partialorder %v3026_v39, 0.0  ;;  %v3090_v50 = vmul.f32 0.1, %v3026_v39  ;;  %v3027_v60 = vadd.f32 %v5299_v2, %v2988_v14 }
 0x204   : > { %vm3056_vm14 = vcmp.gt.f32.partialorder %v3024_v15, 0.0  ;;  %v3088_v30 = vmul.f32 0.1, %v3024_v15  ;;  %v3025_v38 = vadd.f32 %v5299_v2, %v2986_v48 }
 0x205   : > { %v3122_v56 = vsel %vm3058_vm13, %v3026_v39, %v3090_v50  ;;  %vm3059_vm15 = vcmp.gt.f32.partialorder %v3027_v60, 0.0  ;;  %v3091_v28 = vmul.f32 0.1, %v3027_v60 }
 0x206   : > { %v3645_v37 = vpack.c.bf16 %v3122_v56, %v3122_v56  ;;  %v3120_v10 = vsel %vm3056_vm14, %v3024_v15, %v3088_v30  ;;  %vm3057_vm1 = vcmp.gt.f32.partialorder %v3025_v38, 0.0  ;;  %v3089_v29 = vmul.f32 0.1, %v3025_v38  ;;  %v3718_v8 = vpop.f32.mrb[4].mxu1 }
 0x207   : > { %v3643_v40 = vpack.c.bf16 %v3120_v10, %v3120_v10  ;;  %v3123_v18 = vsel %vm3059_vm15, %v3027_v60, %v3091_v28  ;;  %v3003_v63 = vmul.f32 %v3718_v8, %v5294_v31  ;;  %v2927_v17 = vpop.f32.mrb[5].mxu1 }
 0x208   : > { %3283 = vst.msk [vmem:[%s5314_s22 + $0x18] sm:$0xf] %vm3276_vm6, %v3645_v37  ;;  %v3646_v59 = vpack.c.bf16 %v3123_v18, %v3123_v18  ;;  %v3121_v58 = vsel %vm3057_vm1, %v3025_v38, %v3089_v29  ;;  %v3001_v0 = vmul.f32 %v5294_v31, %v2927_v17  ;;  %v3719_v61 = vpop.f32.mrb[6].mxu1 }
 0x209   : > { %3281 = vst.msk [vmem:[%s5314_s22 + $0x10] sm:$0xf] %vm3276_vm6, %v3643_v40  ;;  %v3644_v47 = vpack.c.bf16 %v3121_v58, %v3121_v58  ;;  %v3042_v4 = vadd.f32 %v5299_v2, %v3003_v63  ;;  %v3004_v53 = vmul.f32 %v3719_v61, %v5294_v31  ;;  %v2930_v1 = vpop.f32.mrb[7].mxu1 }
 0x20a   : > { %3284 = vst.msk [vmem:[%s5314_s22 + $0x1c] sm:$0xf] %vm3276_vm6, %v3646_v59  ;;  %v3040_v51 = vadd.f32 %v5299_v2, %v3001_v0  ;;  %v3002_v41 = vmul.f32 %v5294_v31, %v2930_v1 }
 0x20b   : > { %3282 = vst.msk [vmem:[%s5314_s22 + $0x14] sm:$0xf] %vm3276_vm6, %v3644_v47  ;;  %vm3074_vm3 = vcmp.gt.f32.partialorder %v3042_v4, 0.0  ;;  %v3106_v20 = vmul.f32 0.1, %v3042_v4  ;;  %v3043_v19 = vadd.f32 %v5299_v2, %v3004_v53 }
 0x20c   : > { %vm3072_vm4 = vcmp.gt.f32.partialorder %v3040_v51, 0.0  ;;  %v3104_v11 = vmul.f32 0.1, %v3040_v51  ;;  %v3041_v25 = vadd.f32 %v5299_v2, %v3002_v41 }
 0x20d   : > { %v3138_v57 = vsel %vm3074_vm3, %v3042_v4, %v3106_v20  ;;  %vm3075_vm5 = vcmp.gt.f32.partialorder %v3043_v19, 0.0  ;;  %v3107_v21 = vmul.f32 0.1, %v3043_v19 }
 0x20e   : > { %v3661_v35 = vpack.c.bf16 %v3138_v57, %v3138_v57  ;;  %v3136_v24 = vsel %vm3072_vm4, %v3040_v51, %v3104_v11  ;;  %vm3073_vm0 = vcmp.gt.f32.partialorder %v3041_v25, 0.0  ;;  %v3105_v49 = vmul.f32 0.1, %v3041_v25 }
 0x20f   : > { %v3659_v36 = vpack.c.bf16 %v3136_v24, %v3136_v24  ;;  %v3139_v55 = vsel %vm3075_vm5, %v3043_v19, %v3107_v21 }
 0x210   : > { %3299 = vst.msk [vmem:[%s5314_s22 + $0x58] sm:$0xf] %vm3276_vm6, %v3661_v35  ;;  %v3662_v5 = vpack.c.bf16 %v3139_v55, %v3139_v55  ;;  %v3137_v6 = vsel %vm3073_vm0, %v3041_v25, %v3105_v49 }
 0x211   : > { %3297 = vst.msk [vmem:[%s5314_s22 + $0x50] sm:$0xf] %vm3276_vm6, %v3659_v36  ;;  %v3660_v42 = vpack.c.bf16 %v3137_v6, %v3137_v6 }
 0x212   : > { %3300 = vst.msk [vmem:[%s5314_s22 + $0x5c] sm:$0xf] %vm3276_vm6, %v3662_v5 }
 0x213   : > { %3298 = vst.msk [vmem:[%s5314_s22 + $0x54] sm:$0xf] %vm3276_vm6, %v3660_v42 }
 0x23e   : > { %v3706_v32 = vpop.f32.mrb[8].mxu0 }
 0x23f   : > { %v2991_v3 = vmul.f32 %v3706_v32, %v5294_v31  ;;  %v2879_v43 = vpop.f32.mrb[9].mxu0 }
 0x240   : > { %v2989_v9 = vmul.f32 %v5294_v31, %v2879_v43  ;;  %v3707_v52 = vpop.f32.mrb[10].mxu0 }
 0x241   : > { %v3030_v13 = vadd.f32 %v5299_v2, %v2991_v3  ;;  %v2992_v12 = vmul.f32 %v3707_v52, %v5294_v31  ;;  %v2882_v33 = vpop.f32.mrb[11].mxu0 }
 0x242   : > { %v3028_v16 = vadd.f32 %v5299_v2, %v2989_v9  ;;  %v2990_v27 = vmul.f32 %v5294_v31, %v2882_v33 }
 0x243   : > { %vm3062_vm2 = vcmp.gt.f32.partialorder %v3030_v13, 0.0  ;;  %v3094_v7 = vmul.f32 0.1, %v3030_v13  ;;  %v3031_v45 = vadd.f32 %v5299_v2, %v2992_v12 }
 0x244   : > { %vm3060_vm7 = vcmp.gt.f32.partialorder %v3028_v16, 0.0  ;;  %v3092_v54 = vmul.f32 0.1, %v3028_v16  ;;  %v3029_v22 = vadd.f32 %v5299_v2, %v2990_v27 }
 0x245   : > { %v3126_v26 = vsel %vm3062_vm2, %v3030_v13, %v3094_v7  ;;  %vm3063_vm8 = vcmp.gt.f32.partialorder %v3031_v45, 0.0  ;;  %v3095_v23 = vmul.f32 0.1, %v3031_v45 }
 0x246   : > { %v3649_v62 = vpack.c.bf16 %v3126_v26, %v3126_v26  ;;  %v3124_v34 = vsel %vm3060_vm7, %v3028_v16, %v3092_v54  ;;  %vm3061_vm9 = vcmp.gt.f32.partialorder %v3029_v22, 0.0  ;;  %v3093_v44 = vmul.f32 0.1, %v3029_v22 }
 0x247   : > { %v3647_v39 = vpack.c.bf16 %v3124_v34, %v3124_v34  ;;  %v3127_v14 = vsel %vm3063_vm8, %v3031_v45, %v3095_v23  ;;  %v3722_v46 = vpop.f32.mrb[8].mxu1 }
 0x248   : > { %3287 = vst.msk [vmem:[%s5314_s22 + $0x28] sm:$0xf] %vm3276_vm6, %v3649_v62  ;;  %v3650_v15 = vpack.c.bf16 %v3127_v14, %v3127_v14  ;;  %v3125_v48 = vsel %vm3061_vm9, %v3029_v22, %v3093_v44  ;;  %v3007_v50 = vmul.f32 %v3722_v46, %v5294_v31  ;;  %v2943_v60 = vpop.f32.mrb[9].mxu1 }
 0x249   : > { %3285 = vst.msk [vmem:[%s5314_s22 + $0x20] sm:$0xf] %vm3276_vm6, %v3647_v39  ;;  %v3648_v30 = vpack.c.bf16 %v3125_v48, %v3125_v48  ;;  %v3005_v38 = vmul.f32 %v5294_v31, %v2943_v60  ;;  %v3723_v56 = vpop.f32.mrb[10].mxu1 }
 0x24a   : > { %3288 = vst.msk [vmem:[%s5314_s22 + $0x2c] sm:$0xf] %vm3276_vm6, %v3650_v15  ;;  %v3046_v28 = vadd.f32 %v5299_v2, %v3007_v50  ;;  %v3008_v37 = vmul.f32 %v3723_v56, %v5294_v31  ;;  %v2946_v10 = vpop.f32.mrb[11].mxu1 }
 0x24b   : > { %3286 = vst.msk [vmem:[%s5314_s22 + $0x24] sm:$0xf] %vm3276_vm6, %v3648_v30  ;;  %v3044_v29 = vadd.f32 %v5299_v2, %v3005_v38  ;;  %v3006_v40 = vmul.f32 %v5294_v31, %v2946_v10 }
 0x24c   : > { %vm3078_vm10 = vcmp.gt.f32.partialorder %v3046_v28, 0.0  ;;  %v3110_v18 = vmul.f32 0.1, %v3046_v28  ;;  %v3047_v8 = vadd.f32 %v5299_v2, %v3008_v37 }
 0x24d   : > { %vm3076_vm11 = vcmp.gt.f32.partialorder %v3044_v29, 0.0  ;;  %v3108_v59 = vmul.f32 0.1, %v3044_v29  ;;  %v3045_v58 = vadd.f32 %v5299_v2, %v3006_v40 }
 0x24e   : > { %v3142_v63 = vsel %vm3078_vm10, %v3046_v28, %v3110_v18  ;;  %vm3079_vm12 = vcmp.gt.f32.partialorder %v3047_v8, 0.0  ;;  %v3111_v17 = vmul.f32 0.1, %v3047_v8 }
 0x24f   : > { %v3665_v47 = vpack.c.bf16 %v3142_v63, %v3142_v63  ;;  %v3140_v0 = vsel %vm3076_vm11, %v3044_v29, %v3108_v59  ;;  %vm3077_vm13 = vcmp.gt.f32.partialorder %v3045_v58, 0.0  ;;  %v3109_v61 = vmul.f32 0.1, %v3045_v58 }
 0x250   : > { %v3663_v4 = vpack.c.bf16 %v3140_v0, %v3140_v0  ;;  %v3143_v53 = vsel %vm3079_vm12, %v3047_v8, %v3111_v17 }
 0x251   : > { %3303 = vst.msk [vmem:[%s5314_s22 + $0x68] sm:$0xf] %vm3276_vm6, %v3665_v47  ;;  %v3666_v1 = vpack.c.bf16 %v3143_v53, %v3143_v53  ;;  %v3141_v51 = vsel %vm3077_vm13, %v3045_v58, %v3109_v61 }
 0x252   : > { %3301 = vst.msk [vmem:[%s5314_s22 + $0x60] sm:$0xf] %vm3276_vm6, %v3663_v4  ;;  %v3664_v41 = vpack.c.bf16 %v3141_v51, %v3141_v51 }
 0x253   : > { %3304 = vst.msk [vmem:[%s5314_s22 + $0x6c] sm:$0xf] %vm3276_vm6, %v3666_v1 }
 0x254   : > { %3302 = vst.msk [vmem:[%s5314_s22 + $0x64] sm:$0xf] %vm3276_vm6, %v3664_v41 }
 0x27a   : > { %v3710_v20 = vpop.f32.mrb[12].mxu0 }
 0x27b   : > { %v2995_v19 = vmul.f32 %v3710_v20, %v5294_v31  ;;  %v2895_v11 = vpop.f32.mrb[13].mxu0 }
 0x27c   : > { %v2993_v25 = vmul.f32 %v5294_v31, %v2895_v11  ;;  %v3711_v57 = vpop.f32.mrb[14].mxu0 }
 0x27d   : > { %v3034_v21 = vadd.f32 %v5299_v2, %v2995_v19  ;;  %v2996_v35 = vmul.f32 %v3711_v57, %v5294_v31  ;;  %v2898_v24 = vpop.f32.mrb[15].mxu0 }
 0x27e   : > { %v3032_v49 = vadd.f32 %v5299_v2, %v2993_v25  ;;  %v2994_v36 = vmul.f32 %v5294_v31, %v2898_v24 }
 0x27f   : > { %vm3066_vm14 = vcmp.gt.f32.partialorder %v3034_v21, 0.0  ;;  %v3098_v55 = vmul.f32 0.1, %v3034_v21  ;;  %v3035_v5 = vadd.f32 %v5299_v2, %v2996_v35 }
 0x280   : > { %vm3064_vm15 = vcmp.gt.f32.partialorder %v3032_v49, 0.0  ;;  %v3096_v6 = vmul.f32 0.1, %v3032_v49  ;;  %v3033_v42 = vadd.f32 %v5299_v2, %v2994_v36 }
 0x281   : > { %v3130_v32 = vsel %vm3066_vm14, %v3034_v21, %v3098_v55  ;;  %vm3067_vm1 = vcmp.gt.f32.partialorder %v3035_v5, 0.0  ;;  %v3099_v3 = vmul.f32 0.1, %v3035_v5 }
 0x282   : > { %v3653_v43 = vpack.c.bf16 %v3130_v32, %v3130_v32  ;;  %v3128_v9 = vsel %vm3064_vm15, %v3032_v49, %v3096_v6  ;;  %vm3065_vm3 = vcmp.gt.f32.partialorder %v3033_v42, 0.0  ;;  %v3097_v52 = vmul.f32 0.1, %v3033_v42 }
 0x283   : > { %v3651_v13 = vpack.c.bf16 %v3128_v9, %v3128_v9  ;;  %v3131_v12 = vsel %vm3067_vm1, %v3035_v5, %v3099_v3  ;;  %v3726_v33 = vpop.f32.mrb[12].mxu1 }
 0x284   : > { %3291 = vst.msk [vmem:[%s5314_s22 + $0x38] sm:$0xf] %vm3276_vm6, %v3653_v43  ;;  %v3654_v16 = vpack.c.bf16 %v3131_v12, %v3131_v12  ;;  %v3129_v27 = vsel %vm3065_vm3, %v3033_v42, %v3097_v52  ;;  %v3011_v7 = vmul.f32 %v3726_v33, %v5294_v31  ;;  %v2959_v45 = vpop.f32.mrb[13].mxu1 }
 0x285   : > { %3289 = vst.msk [vmem:[%s5314_s22 + $0x30] sm:$0xf] %vm3276_vm6, %v3651_v13  ;;  %v3652_v54 = vpack.c.bf16 %v3129_v27, %v3129_v27  ;;  %v3009_v22 = vmul.f32 %v5294_v31, %v2959_v45  ;;  %v3727_v26 = vpop.f32.mrb[14].mxu1 }
 0x286   : > { %3292 = vst.msk [vmem:[%s5314_s22 + $0x3c] sm:$0xf] %vm3276_vm6, %v3654_v16  ;;  %v3050_v23 = vadd.f32 %v5299_v2, %v3011_v7  ;;  %v3012_v62 = vmul.f32 %v3727_v26, %v5294_v31  ;;  %v2962_v34 = vpop.f32.mrb[15].mxu1 }
 0x287   : > { %3290 = vst.msk [vmem:[%s5314_s22 + $0x34] sm:$0xf] %vm3276_vm6, %v3652_v54  ;;  %v3048_v44 = vadd.f32 %v5299_v2, %v3009_v22  ;;  %v3010_v39 = vmul.f32 %v5294_v31, %v2962_v34 }
 0x288   : > { %vm3082_vm4 = vcmp.gt.f32.partialorder %v3050_v23, 0.0  ;;  %v3114_v14 = vmul.f32 0.1, %v3050_v23  ;;  %v3051_v46 = vadd.f32 %v5299_v2, %v3012_v62 }
 0x289   : > { %vm3080_vm5 = vcmp.gt.f32.partialorder %v3048_v44, 0.0  ;;  %v3112_v15 = vmul.f32 0.1, %v3048_v44  ;;  %v3049_v48 = vadd.f32 %v5299_v2, %v3010_v39 }
 0x28a   : > { %v3146_v50 = vsel %vm3082_vm4, %v3050_v23, %v3114_v14  ;;  %vm3083_vm0 = vcmp.gt.f32.partialorder %v3051_v46, 0.0  ;;  %v3115_v60 = vmul.f32 0.1, %v3051_v46 }
 0x28b   : > { %v3669_v30 = vpack.c.bf16 %v3146_v50, %v3146_v50  ;;  %v3144_v38 = vsel %vm3080_vm5, %v3048_v44, %v3112_v15  ;;  %vm3081_vm2 = vcmp.gt.f32.partialorder %v3049_v48, 0.0  ;;  %v3113_v56 = vmul.f32 0.1, %v3049_v48 }
 0x28c   : > { %v3667_v31 = vpack.c.bf16 %v3144_v38, %v3144_v38  ;;  %v3147_v28 = vsel %vm3083_vm0, %v3051_v46, %v3115_v60 }
 0x28d   : > { %3307 = vst.msk [vmem:[%s5314_s22 + $0x78] sm:$0xf] %vm3276_vm6, %v3669_v30  ;;  %v3670_v37 = vpack.c.bf16 %v3147_v28, %v3147_v28  ;;  %v3145_v10 = vsel %vm3081_vm2, %v3049_v48, %v3113_v56 }
 0x28e   : > { %3305 = vst.msk [vmem:[%s5314_s22 + $0x70] sm:$0xf] %vm3276_vm6, %v3667_v31  ;;  %v3668_v29 = vpack.c.bf16 %v3145_v10, %v3145_v10 }
 0x28f   : > { %3308 = vst.msk [vmem:[%s5314_s22 + $0x7c] sm:$0xf] %vm3276_vm6, %v3670_v37 }
 0x290   : > { %3306 = vst.msk [vmem:[%s5314_s22 + $0x74] sm:$0xf] %vm3276_vm6, %v3668_v29 }
 0x291 PF: > { %s14_s17 = sadd.s32 1, %s3933_s17   ;;  %s5473_s15 = smov %s3929_s16 }
 0x292   : > { %p11_p5 = scmp.ge.s32.totalorder %s14_s17, 4   ;;  %s5474_s16 = smov %s5476_s18 }
 0x294   :  { %13 = sbr.rel (!%p11_p5) target bundleno = 2 (0x2), region = 77 }

</bundles_post_ra>
